<compile_context>
chip_gen: v6e
topology: v6e:2x2x1
jax: 0.10.0
libtpu: 0.0.40
codegen_flags: <defaults>
</compile_context>

<pallas_src>
import functools

import jax
import jax.numpy as jnp
from jax import lax
from jax.experimental import pallas as pl
from jax.experimental.pallas import tpu as pltpu


def _round_up(x, m):
    return (x + m - 1) // m * m


def _vmem_limit_bytes():
    """Generation-aware VMEM request: leave Mosaic internal-scratch headroom on v7x
    (64 MiB physical), use a larger budget on v5e/v6e (128 MiB physical)."""
    try:
        cap = pltpu.get_tpu_info().vmem_capacity_bytes
    except Exception:
        cap = 64 * 1024 * 1024          # conservative fallback, safe on every generation
    return int(min(cap - 8 * 1024 * 1024, 110 * 1024 * 1024))


def _gst_kernel(x_ref, w_ref, o_ref, qkv_ref, *,
                heads, head_dim, n_valid, q_tile, exp_bf16):
    # x_ref  : (1, C, Np)        pooled volume for this batch (block index constant over qi)
    # w_ref  : (3C, C)           qkv projection weight (head-major [q;k;v] row blocks)
    # o_ref  : (1, C, q_tile)    output block for this query tile
    # qkv_ref: (3C, Np)          persistent VMEM scratch (mm_dtype), recomputed at qi == 0
    qi = pl.program_id(1)
    n_pad = x_ref.shape[-1]
    mm_dtype = qkv_ref.dtype

    # ---- qkv projection: once per batch, chunked over the spatial axis so only a
    #      (3C, q_tile) f32 accumulator tile is transiently live; stored as mm_dtype (bf16
    #      on the fast path) -> halves the resident qkv footprint vs f32.
    @pl.when(qi == 0)
    def _project():
        w = w_ref[...]

        @pl.loop(0, n_pad // q_tile)
        def _(c):
            off = pl.multiple_of(c * q_tile, 128)
            xc = x_ref[0, :, pl.ds(off, q_tile)]                     # (C, q_tile)
            qkv_ref[:, pl.ds(off, q_tile)] = jnp.dot(
                w, xc, preferred_element_type=jnp.float32).astype(mm_dtype)

    # ---- key-padding additive bias (keys on the sublane axis), hoisted out of the head loop.
    if n_valid < n_pad:
        key_row = lax.broadcasted_iota(jnp.int32, (n_pad, 1), 0)
        key_bias = jnp.where(key_row < n_valid, 0.0, -1e30).astype(jnp.float32)
    else:
        key_bias = None

    q_off = pl.multiple_of(qi * q_tile, 128)

    for h in range(heads):
        base = 3 * head_dim * h
        q = qkv_ref[base:base + head_dim, pl.ds(q_off, q_tile)]       # (hd, tq)
        k = qkv_ref[base + head_dim:base + 2 * head_dim, :]           # (hd, Np)
        v = qkv_ref[base + 2 * head_dim:base + 3 * head_dim, :]       # (hd, Np)

        # s[m, n] = sum_d k[d, m] * q[d, n]  -> (Np, tq): keys on sublanes, queries on lanes.
        s = lax.dot_general(k, q,
                            dimension_numbers=(((0,), (0,)), ((), ())),
                            preferred_element_type=jnp.float32)
        if key_bias is not None:
            s = s + key_bias                                          # mask padded keys
        s = s - jnp.max(s, axis=0, keepdims=True)                     # f32 max-subtraction

        # softmax numerator; optional bf16 exp (v6e/v7x EUP bf16 path; keep f32 on v5e).
        # NOTE: no 1/sqrt(head_dim) scale -- matches the PyTorch module, which defines
        # `scale` but never applies it in forward().
        p = jnp.exp(s.astype(jnp.bfloat16) if exp_bf16 else s)        # (Np, tq)
        denom = jnp.sum(p.astype(jnp.float32), axis=0, keepdims=True)  # (1, tq) f32
        inv = pl.reciprocal(denom, approx=True)
        inv = inv * (2.0 - denom * inv)                               # one Newton step

        # out = v @ p (unnormalized probabilities), NN dot on the MXU -> (hd, tq);
        # fold 1/denom into the small output tile instead of the (Np, tq) tile.
        out = lax.dot_general(v, p.astype(mm_dtype),
                              dimension_numbers=(((1,), (0,)), ((), ())),
                              preferred_element_type=jnp.float32)
        out = out * inv                                               # (1,tq) bcast over sublanes

        oc = h * head_dim
        o_ref[0, oc:oc + head_dim, :] = out.astype(o_ref.dtype)       # lane-dense per-head store


def global_sparse_transformer(x, qkv_weight, r, heads, *,
                              q_tile=256, use_bf16=True, exp_bf16=None):
    """SlimUNETR GlobalSparseTransformer forward.

    x: (B, C, H, W, Z) float32, qkv_weight: (3C, C, 1, 1, 1).  Returns (B, C, H', W', Z').

    NOTE (intentional upstream-bug reproduction): the PyTorch module defines
    `scale = head_dim ** -0.5` but never applies it in forward(); this kernel deliberately
    omits the 1/sqrt(head_dim) scaling to match.

    q_tile: query-row tile (grid axis).  256 recommended on v7x, up to 1024 on v5e/v6e.
    use_bf16: bf16 MXU inputs (f32 accumulation / softmax statistics).
    exp_bf16: compute exp on the bf16 EUP path (recommended on v6e/v7x, NOT on v5e);
              defaults to use_bf16.
    """
    if exp_bf16 is None:
        exp_bf16 = use_bf16
    B, C, H, W, Z = x.shape
    assert C % heads == 0, (C, heads)
    head_dim = C // heads

    # AvgPool3d(kernel_size=1, stride=r) == strided subsampling (JAX glue).
    xs = x[:, :, ::r, ::r, ::r]
    Hp, Wp, Zp = xs.shape[2], xs.shape[3], xs.shape[4]
    N = Hp * Wp * Zp
    Np = _round_up(N, 128)       # lane-dense padding (consider 256 alignment on v6e/v7x)

    # Query tile must divide Np; Np is a multiple of 128, so this terminates at 128.
    q_tile = max(128, min(q_tile, Np)) // 128 * 128
    while Np % q_tile:
        q_tile -= 128

    x_flat = xs.reshape(B, C, N)
    if Np != N:
        x_flat = jnp.pad(x_flat, ((0, 0), (0, 0), (0, Np - N)))

    # Conv weight (3C, C, 1, 1, 1) -> (3C, C); rows are head-major blocks of [q; k; v].
    w = qkv_weight.reshape(3 * C, C)

    mm_dtype = jnp.bfloat16 if use_bf16 else jnp.float32
    x_in = x_flat.astype(mm_dtype)
    w_in = w.astype(mm_dtype)

    kernel = functools.partial(
        _gst_kernel, heads=heads, head_dim=head_dim, n_valid=N,
        q_tile=q_tile, exp_bf16=exp_bf16)

    out_flat = pl.pallas_call(
        kernel,
        out_shape=jax.ShapeDtypeStruct((B, C, Np), x.dtype),
        grid_spec=pltpu.PrefetchScalarGridSpec(
            num_scalar_prefetch=0,
            grid=(B, Np // q_tile),
            in_specs=[
                pl.BlockSpec((1, C, Np), lambda b, qi: (b, 0, 0)),
                pl.BlockSpec((3 * C, C), lambda b, qi: (0, 0)),
            ],
            out_specs=pl.BlockSpec((1, C, q_tile), lambda b, qi: (b, 0, qi)),
            scratch_shapes=[pltpu.VMEM((3 * C, Np), mm_dtype)],
        ),
        compiler_params=pltpu.CompilerParams(
            dimension_semantics=("parallel", "arbitrary"),
            vmem_limit_bytes=_vmem_limit_bytes()),
    )(x_in, w_in)

    return out_flat[:, :, :N].reshape(B, C, Hp, Wp, Zp)


def _reference(x, qkv_weight, r, heads):
    """Pure-JAX reference mirroring the PyTorch forward (high-precision matmuls)."""
    B, C = x.shape[0], x.shape[1]
    head_dim = C // heads
    xs = x[:, :, ::r, ::r, ::r]
    Hp, Wp, Zp = xs.shape[2], xs.shape[3], xs.shape[4]
    N = Hp * Wp * Zp
    x_flat = xs.reshape(B, C, N)
    w = qkv_weight.reshape(3 * C, C)
    qkv = jnp.einsum('oc,bcn->bon', w, x_flat,
                     precision=lax.Precision.HIGHEST).reshape(B, heads, 3 * head_dim, N)
    q = qkv[:, :, :head_dim]
    k = qkv[:, :, head_dim:2 * head_dim]
    v = qkv[:, :, 2 * head_dim:]
    attn = jax.nn.softmax(
        jnp.einsum('bhdn,bhdm->bhnm', q, k, precision=lax.Precision.HIGHEST), axis=-1)
    out = jnp.einsum('bhdm,bhnm->bhdn', v, attn, precision=lax.Precision.HIGHEST)
    return out.reshape(B, C, Hp, Wp, Zp)


if __name__ == "__main__":
    key = jax.random.PRNGKey(0)
    k_x, k_w = jax.random.split(key)

    # Small but representative: pooled N = 7^3 = 343 (not a 128 multiple -> exercises the
    # key-padding mask) and Np = 384 > q_tile -> exercises the query-tile grid axis.
    # head_dim = 16 (multiple of 16 -> bf16-sublane-aligned per-head slices).
    B, C, H, W, Z = 2, 32, 14, 14, 14
    heads, r = 2, 2

    x = jax.random.normal(k_x, (B, C, H, W, Z), dtype=jnp.float32)
    # Conv3d(C, 3C, kernel_size=1, bias=False) weight, deterministic init.
    qkv_weight = (jax.random.normal(k_w, (3 * C, C, 1, 1, 1), dtype=jnp.float32)
                  * (0.5 / jnp.sqrt(C)))

    ref = _reference(x, qkv_weight, r, heads)

    # f32 matmul / f32 exp path: tight tolerance.
    out_f32 = jax.block_until_ready(
        global_sparse_transformer(x, qkv_weight, r, heads, use_bf16=False))
    assert out_f32.shape == ref.shape, (out_f32.shape, ref.shape)
    err32 = float(jnp.max(jnp.abs(out_f32 - ref)))
    assert err32 < 5e-3, err32

    # bf16 matmul + bf16 exp path (default; v6e/v7x fast path), f32 accumulation / stats.
    out_bf16 = jax.block_until_ready(
        global_sparse_transformer(x, qkv_weight, r, heads, use_bf16=True))
    assert out_bf16.shape == ref.shape, (out_bf16.shape, ref.shape)
    assert jnp.allclose(out_bf16, ref, atol=5e-2, rtol=5e-2), \
        float(jnp.max(jnp.abs(out_bf16 - ref)))

    print("KERNEL_OK")
</pallas_src>

<mosaic_0001>
module attributes {stable_mosaic.version = 11 : i64} {
  func.func @_gst_kernel(%arg0: i32, %arg1: i32, %arg2: memref<1x32x384xf32, #tpu.memory_space<vmem>>, %arg3: memref<96x32xf32, #tpu.memory_space<vmem>>, %arg4: memref<1x32x128xf32, #tpu.memory_space<vmem>>, %arg5: memref<96x384xf32, #tpu.memory_space<vmem>>) attributes {dimension_semantics = [#tpu.dimension_semantics<parallel>, #tpu.dimension_semantics<arbitrary>], iteration_bounds = array<i64: 2, 3>, scalar_prefetch = 0 : i64, scratch_operands = 1 : i64, tpu.core_type = #tpu.core_type<tc>, window_params = [{transform_indices = @transform_0, window_bounds = array<i64: 1, 32, 384>}, {pipeline_mode = #tpu.pipeline_mode<synchronous>, transform_indices = @transform_1, window_bounds = array<i64: 96, 32>}, {transform_indices = @transform_2, window_bounds = array<i64: 1, 32, 128>}]} {
    %c0_i32 = arith.constant 0 : i32
    %0 = arith.cmpi eq, %arg1, %c0_i32 : i32
    %1 = arith.extui %0 : i1 to i32
    %c0_i32_0 = arith.constant 0 : i32
    %2 = arith.cmpi ne, %1, %c0_i32_0 : i32
    scf.if %2 {
      %c0_22 = arith.constant 0 : index
      %c0_23 = arith.constant 0 : index
      %61 = vector.load %arg3[%c0_22, %c0_23] : memref<96x32xf32, #tpu.memory_space<vmem>>, vector<96x32xf32>
      %c0_i32_24 = arith.constant 0 : i32
      %c3_i32 = arith.constant 3 : i32
      %62 = arith.addi %c0_i32_24, %c3_i32 : i32
      %c1_i32 = arith.constant 1 : i32
      scf.for %arg6 = %c0_i32_24 to %62 step %c1_i32  : i32 {
        %c1_i32_26 = arith.constant 1 : i32
        %63 = arith.muli %arg6, %c1_i32_26 : i32
        %c0_i32_27 = arith.constant 0 : i32
        %64 = arith.addi %c0_i32_27, %63 : i32
        %c128_i32_28 = arith.constant 128 : i32
        %65 = arith.muli %64, %c128_i32_28 : i32
        %66 = tpu.assume_multiple %65, 128 : i32
        %c0_29 = arith.constant 0 : index
        %c0_30 = arith.constant 0 : index
        %67 = arith.index_cast %66 : i32 to index
        %68 = vector.load %arg2[%c0_29, %c0_30, %67] : memref<1x32x384xf32, #tpu.memory_space<vmem>>, vector<1x32x128xf32>
        %69 = vector.shape_cast %68 : vector<1x32x128xf32> to vector<32x128xf32>
        %cst_31 = arith.constant dense<0.000000e+00> : vector<96x128xf32>
        %70 = tpu.matmul %61, %69, %cst_31 {dimension_numbers = #tpu.dot_dimension_numbers<[1], [0], [0], [1], [0, 0, 1, 1], [], []>} : vector<96x32xf32>, vector<32x128xf32>, vector<96x128xf32> -> vector<96x128xf32>
        %c0_32 = arith.constant 0 : index
        %71 = arith.index_cast %66 : i32 to index
        %72 = vector.load %arg5[%c0_32, %71] : memref<96x384xf32, #tpu.memory_space<vmem>>, vector<96x128xf32>
        tpu.vector_store %arg5[%c0_32, %71], %70 {strides = array<i32>} : memref<96x384xf32, #tpu.memory_space<vmem>>, vector<96x128xf32>,
      }
      %c3_i32_25 = arith.constant 3 : i32
    } else {
    }
    %3 = tpu.iota {dimensions = array<i32: 0>} : vector<384x1xi32>
    %c343_i32 = arith.constant 343 : i32
    %4 = vector.broadcast %c343_i32 : i32 to vector<384x1xi32>
    %5 = arith.cmpi slt, %3, %4 : vector<384x1xi32>
    %cst = arith.constant 0.000000e+00 : f32
    %cst_1 = arith.constant -1.000000e+30 : f32
    %6 = vector.broadcast %cst : f32 to vector<384x1xf32>
    %7 = vector.broadcast %cst_1 : f32 to vector<384x1xf32>
    %8 = arith.select %5, %6, %7 : vector<384x1xi1>, vector<384x1xf32>
    %c128_i32 = arith.constant 128 : i32
    %9 = arith.muli %arg1, %c128_i32 : i32
    %10 = tpu.assume_multiple %9, 128 : i32
    %c0 = arith.constant 0 : index
    %11 = arith.index_cast %10 : i32 to index
    %12 = vector.load %arg5[%c0, %11] : memref<96x384xf32, #tpu.memory_space<vmem>>, vector<16x128xf32>
    %c16 = arith.constant 16 : index
    %c0_2 = arith.constant 0 : index
    %13 = vector.load %arg5[%c16, %c0_2] : memref<96x384xf32, #tpu.memory_space<vmem>>, vector<16x384xf32>
    %c32 = arith.constant 32 : index
    %c0_3 = arith.constant 0 : index
    %14 = vector.load %arg5[%c32, %c0_3] : memref<96x384xf32, #tpu.memory_space<vmem>>, vector<16x384xf32>
    %cst_4 = arith.constant dense<0.000000e+00> : vector<384x128xf32>
    %15 = tpu.matmul %13, %12, %cst_4 {dimension_numbers = #tpu.dot_dimension_numbers<[0], [0], [1], [1], [0, 1, 1, 1], [], []>} : vector<16x384xf32>, vector<16x128xf32>, vector<384x128xf32> -> vector<384x128xf32>
    %16 = vector.broadcast %8 : vector<384x1xf32> to vector<384x128xf32>
    %17 = arith.addf %15, %16 : vector<384x128xf32>
    %cst_5 = arith.constant dense<0xFF800000> : vector<128xf32>
    %18 = vector.multi_reduction <maximumf>, %17, %cst_5 [0] : vector<384x128xf32> to vector<128xf32>
    %19 = vector.shape_cast %18 : vector<128xf32> to vector<1x128xf32>
    %20 = vector.broadcast %19 : vector<1x128xf32> to vector<384x128xf32>
    %21 = arith.subf %17, %20 : vector<384x128xf32>
    %22 = math.exp %21 : vector<384x128xf32>
    %cst_6 = arith.constant dense<0.000000e+00> : vector<128xf32>
    %23 = vector.multi_reduction <add>, %22, %cst_6 [0] : vector<384x128xf32> to vector<128xf32>
    %24 = vector.shape_cast %23 : vector<128xf32> to vector<1x128xf32>
    %25 = tpu.reciprocal %24 {approx = true} : vector<1x128xf32> -> vector<1x128xf32>
    %26 = arith.mulf %24, %25 : vector<1x128xf32>
    %cst_7 = arith.constant 2.000000e+00 : f32
    %27 = vector.broadcast %cst_7 : f32 to vector<1x128xf32>
    %28 = arith.subf %27, %26 : vector<1x128xf32>
    %29 = arith.mulf %25, %28 : vector<1x128xf32>
    %cst_8 = arith.constant dense<0.000000e+00> : vector<16x128xf32>
    %30 = tpu.matmul %14, %22, %cst_8 {dimension_numbers = #tpu.dot_dimension_numbers<[1], [0], [0], [1], [0, 0, 1, 1], [], []>} : vector<16x384xf32>, vector<384x128xf32>, vector<16x128xf32> -> vector<16x128xf32>
    %31 = vector.broadcast %29 : vector<1x128xf32> to vector<16x128xf32>
    %32 = arith.mulf %30, %31 : vector<16x128xf32>
    %c0_9 = arith.constant 0 : index
    %c0_10 = arith.constant 0 : index
    %c0_11 = arith.constant 0 : index
    %33 = vector.load %arg4[%c0_9, %c0_10, %c0_11] : memref<1x32x128xf32, #tpu.memory_space<vmem>>, vector<1x16x128xf32>
    %34 = vector.shape_cast %33 : vector<1x16x128xf32> to vector<16x128xf32>
    %35 = vector.shape_cast %32 : vector<16x128xf32> to vector<1x16x128xf32>
    tpu.vector_store %arg4[%c0_9, %c0_10, %c0_11], %35 {strides = array<i32>} : memref<1x32x128xf32, #tpu.memory_space<vmem>>, vector<1x16x128xf32>,
    %c48 = arith.constant 48 : index
    %36 = arith.index_cast %10 : i32 to index
    %37 = vector.load %arg5[%c48, %36] : memref<96x384xf32, #tpu.memory_space<vmem>>, vector<16x128xf32>
    %c64 = arith.constant 64 : index
    %c0_12 = arith.constant 0 : index
    %38 = vector.load %arg5[%c64, %c0_12] : memref<96x384xf32, #tpu.memory_space<vmem>>, vector<16x384xf32>
    %c80 = arith.constant 80 : index
    %c0_13 = arith.constant 0 : index
    %39 = vector.load %arg5[%c80, %c0_13] : memref<96x384xf32, #tpu.memory_space<vmem>>, vector<16x384xf32>
    %cst_14 = arith.constant dense<0.000000e+00> : vector<384x128xf32>
    %40 = tpu.matmul %38, %37, %cst_14 {dimension_numbers = #tpu.dot_dimension_numbers<[0], [0], [1], [1], [0, 1, 1, 1], [], []>} : vector<16x384xf32>, vector<16x128xf32>, vector<384x128xf32> -> vector<384x128xf32>
    %41 = vector.broadcast %8 : vector<384x1xf32> to vector<384x128xf32>
    %42 = arith.addf %40, %41 : vector<384x128xf32>
    %cst_15 = arith.constant dense<0xFF800000> : vector<128xf32>
    %43 = vector.multi_reduction <maximumf>, %42, %cst_15 [0] : vector<384x128xf32> to vector<128xf32>
    %44 = vector.shape_cast %43 : vector<128xf32> to vector<1x128xf32>
    %45 = vector.broadcast %44 : vector<1x128xf32> to vector<384x128xf32>
    %46 = arith.subf %42, %45 : vector<384x128xf32>
    %47 = math.exp %46 : vector<384x128xf32>
    %cst_16 = arith.constant dense<0.000000e+00> : vector<128xf32>
    %48 = vector.multi_reduction <add>, %47, %cst_16 [0] : vector<384x128xf32> to vector<128xf32>
    %49 = vector.shape_cast %48 : vector<128xf32> to vector<1x128xf32>
    %50 = tpu.reciprocal %49 {approx = true} : vector<1x128xf32> -> vector<1x128xf32>
    %51 = arith.mulf %49, %50 : vector<1x128xf32>
    %cst_17 = arith.constant 2.000000e+00 : f32
    %52 = vector.broadcast %cst_17 : f32 to vector<1x128xf32>
    %53 = arith.subf %52, %51 : vector<1x128xf32>
    %54 = arith.mulf %50, %53 : vector<1x128xf32>
    %cst_18 = arith.constant dense<0.000000e+00> : vector<16x128xf32>
    %55 = tpu.matmul %39, %47, %cst_18 {dimension_numbers = #tpu.dot_dimension_numbers<[1], [0], [0], [1], [0, 0, 1, 1], [], []>} : vector<16x384xf32>, vector<384x128xf32>, vector<16x128xf32> -> vector<16x128xf32>
    %56 = vector.broadcast %54 : vector<1x128xf32> to vector<16x128xf32>
    %57 = arith.mulf %55, %56 : vector<16x128xf32>
    %c0_19 = arith.constant 0 : index
    %c16_20 = arith.constant 16 : index
    %c0_21 = arith.constant 0 : index
    %58 = vector.load %arg4[%c0_19, %c16_20, %c0_21] : memref<1x32x128xf32, #tpu.memory_space<vmem>>, vector<1x16x128xf32>
    %59 = vector.shape_cast %58 : vector<1x16x128xf32> to vector<16x128xf32>
    %60 = vector.shape_cast %57 : vector<16x128xf32> to vector<1x16x128xf32>
    tpu.vector_store %arg4[%c0_19, %c16_20, %c0_21], %60 {strides = array<i32>} : memref<1x32x128xf32, #tpu.memory_space<vmem>>, vector<1x16x128xf32>,
    return
  }
  func.func @transform_0(%arg0: i32, %arg1: i32) -> (i32, i32, i32) {
    %c0_i32 = arith.constant 0 : i32
    %c0_i32_0 = arith.constant 0 : i32
    %c0_i32_1 = arith.constant 0 : i32
    return %arg0, %c0_i32, %c0_i32_0 : i32, i32, i32
  }
  func.func @transform_1(%arg0: i32, %arg1: i32) -> (i32, i32) {
    %c0_i32 = arith.constant 0 : i32
    %c0_i32_0 = arith.constant 0 : i32
    %c0_i32_1 = arith.constant 0 : i32
    return %c0_i32, %c0_i32_0 : i32, i32
  }
  func.func @transform_2(%arg0: i32, %arg1: i32) -> (i32, i32, i32) {
    %c0_i32 = arith.constant 0 : i32
    %c0_i32_0 = arith.constant 0 : i32
    return %arg0, %c0_i32, %arg1 : i32, i32, i32
  }
}

</mosaic_0001>

<bundles_post_ra>
// kernel: tpu_custom_call.1
= control target key start
LH: loop header
LB: loop body
LE: loop exit
PB: predicated region body
PF: predicated region fallthrough
CT: control target
= control target key end

     0   :  { %7 = vsyncpa [#allocation4], 0  ;;  %s4839_s0 = inlined_call_operand.hbm [shape: f32[2,32,384], index: 0, kind: input, shape index: {}]   ;;  %s4840_s1 = inlined_call_operand.vmem [shape: f32[96,32], index: 1, kind: input, shape index: {}]   ;;  %s4841_s2 = inlined_call_operand.hbm [shape: f32[2,32,384], index: 2, kind: output, shape index: {}]  }
   0x1   :  { %9 = vsyncpa [#allocation4 + $0x1], 0 }
   0x2   :  { %10 = vsyncpa [#allocation5], 0 }
   0x3   :  { %12 = vsyncpa [#allocation5 + $0x1], 0  ;;  %s3687_s9 = smov 0   ;;  %s3689_s10 = smov 0  }
   0x4   :  { %s3691_s11 = smov 0   ;;  %s3693_s12 = smov 0  }
   0x5   :  { %s3695_s13 = smov 0   ;;  %s3697_s14 = smov 0  }
   0x6   :  { %s3699_s15 = smov 0   ;;  %s3701_s16 = smov 0  }
   0x7   :  { %s3703_s17 = smov 0   ;;  %s3705_s18 = smov 0  }
   0x8   :  { %s3707_s19 = smov 0  }
   0x9 LB: > { %4852 = sst [smem:[#allocation9_spill]] %s3654_s18  ;;  %s2580_s20 = sadd.s32 4294967295, %s3658_s19   ;;  %s3658_s19 = sphi %s3707_s19, %s18_s19   ;;  %s3654_s18 = sphi %s3705_s18, %s4876_s18   ;;  %s3650_s17 = sphi %s3703_s17, %s4884_s17   ;;  %s3646_s16 = sphi %s3701_s16, %s4874_s16   ;;  %s3642_s15 = sphi %s3699_s15, %s4883_s15   ;;  %s3638_s14 = sphi %s3697_s14, %s4882_s14   ;;  %s3634_s13 = sphi %s3695_s13, %s4881_s13   ;;  %s3630_s12 = sphi %s3693_s12, %s4880_s12   ;;  %s3626_s11 = sphi %s3691_s11, %s4879_s11   ;;  %s3622_s10 = sphi %s3689_s10, %s4878_s10   ;;  %s3618_s9 = sphi %s3687_s9, %s4877_s9  }
   0xa   : > { %s2581_s21 = sadd.s32 4294967294, %s3658_s19   ;;  %s27_s22 = sadd.s32 1, %s3650_s17 }
   0xb   : > { %s30_s23 = sadd.s32 1, %s3654_s18  ;;  %p28_p0 = scmp.ge.s32.totalorder %s27_s22, 3 }
   0xc   : > { %s37_s24 = sadd.s32 1, %s3638_s14  ;;  %p44_p1 = scmp.ne.s32.totalorder %s3638_s14, %s3634_s13 }
   0xd   : > { %p45_p2 = scmp.eq.s32.totalorder %s3658_s19, 0  ;;  %s4886_s22 = smov (%p28_p0, %s27_s22), 0 }
   0xe   : > { %4853 = sst [smem:[#allocation10_spill]] %s4886_s22  ;;  %s4888_s23 = smov (!%p28_p0, %s30_s23), %s3654_s18 }
   0xf   : > { %p3751_p3 = por %p45_p2, %p44_p1  ;;  %p50_p4 = scmp.ne.s32.totalorder %s3634_s13, %s3630_s12 }
  0x10   : > { %p32_p5 = scmp.ge.s32.totalorder %s4888_s23, 2  ;;  %p51_p6 = scmp.eq.s32.totalorder %s2580_s20, 0 }
  0x11   : > { %s82_s26 = ssub.s32 %s3650_s17, %s4886_s22  ;;  %s86_s27 = sadd.s32 1, %s3626_s11 }
  0x12   : > { %s4890_s23 = smov (%p32_p5, %s4888_s23), 0  ;;  %p3761_p7 = por %p51_p6, %p50_p4 }
  0x13   : > { %4855 = sst [smem:[#allocation11_spill]] %s4890_s23  ;;  %p96_p8 = scmp.ne.s32.totalorder %s3626_s11, %s3622_s10 }
  0x14   : > { %s34_s29 = ssub.s32 %s3654_s18, %s4890_s23  ;;  %p97_p9 = scmp.eq.s32.totalorder %s2580_s20, 5 }
  0x15   : > { %p35_p10 = scmp.eq.s32.totalorder %s34_s29, 0  ;;  %s83_s30 = sor.u32 %s82_s26, %s34_s29 }
  0x16   : > { %p84_p11 = scmp.eq.s32.totalorder %s83_s30, 0  ;;  %p3769_p12 = por %p97_p9, %p96_p8 }
  0x17   : > { %s3774_s4 = scalar_select %p35_p10, %s3638_s14, %s37_s24  }
  0x18   : > { %s3777_s5 = scalar_select %p84_p11, %s3626_s11, %s86_s27  }
  0x19   : > { %p102_p13 = scmp.ne.s32.totalorder %s3622_s10, %s3618_s9  ;;  %p103_p0 = scmp.eq.s32.totalorder %s2581_s21, 5 }
  0x1a   : > { %p3205_p1 = scmp.lt.s32.totalorder %s3658_s19, 6  ;;  %s126_s7 = sand.u32 1, %s3638_s14  }
  0x1b   : > { %p3782_p2 = por %p103_p0, %p102_p13  ;;  %s3189_s8 = smul.u32 96, %s126_s7 }
  0x1c   : > { %s3190_s12 = smul.u32 1536, %s3654_s18  ;;  %p3790_p4 = pnand %p3205_p1, %p3751_p3 }
  0x1d   : > { %s130_s29 = scalar_lea.vmem [#allocation3], %s3189_s8  ;;  %p2585_p5 = scmp.ge.s32.totalorder %s3658_s19, 1 }
  0x1e   : > { %s136_s27 = scalar_lea.hbm %s4839_s0, %s3190_s12  ;;  %s137_s21 = sshll.u32 %s130_s29, 4  ;;  %s138_s21 = int_to_ptr.vmem [resolvable:$true] %s137_s21 }
  0x1f   : > { %s127_s30 = scalar_lea.sflag [#allocation4], %s126_s7  ;;  %p3508_p6 = pneg %p3790_p4 }
  0x20   : > { %s3519_s23 = scalar_lea.vmem %s138_s21, 1536  ;;  %s3664_s25 = smov [#allocation3]  }
  0x21   : > { %p3520_p8 = scmp.ne.s32.totalorder %s138_s21, %s3519_s23  ;;  %s3524_s22 = sshll.u32 %s3664_s25, 4  ;;  %s3525_s22 = int_to_ptr.vmem [resolvable:$false] %s3524_s22 }
  0x22   : > { %s3526_s18 = scalar_lea.vmem %s3525_s22, 3072  ;;  %p3527_p3 = scmp.lt.s32.totalorder %s138_s21, %s3525_s22 }
  0x23   : > { %p3522_p9 = pnand %p3520_p8, %p3508_p6  ;;  %p3528_p11 = scmp.lt.s32.totalorder %s3526_s18, %s3519_s23 }
  0x25   : > { %p3523_p10 = pneg %p3522_p9  ;;  %p3529_p13 = por %p3528_p11, %p3527_p3 }
  0x27   : > { %p3530_p0 = pnand %p3529_p13, %p3523_p10 }
  0x29   : > { %3533 = shalt.err (!%p3530_p0)
}
  0x2a   : > { %s3665_s8 = smov 384   ;;  %s3666_s7 = smov 24  }
  0x2b   : > { %3200 = dma.hbm_to_vmem [thread:$0]  (!%p3790_p4), %s136_s27, 1536, %s138_s21, %s127_s30, %s3665_s8, %s3665_s8, %s3666_s7  }
  0x2c   : > { %p145_p1 = scmp.lt.s32.totalorder %s3658_s19, 7 }
  0x2e   : > { %p146_p6 = pnand %p2585_p5, %p145_p1 }
  0x30   : > { %149 = sbr.rel (%p146_p6) target bundleno = 1495 (0x5d7), region = 28 }
  0x35   : > { %s151_s12 = sand.u32 1, %s3634_s13  }
  0x36   : > { %s3806_s26 = smul.u32 96, %s151_s12  ;;  %s152_s18 = scalar_lea.sflag [#allocation4], %s151_s12 }
  0x38   : > { %s155_s22 = scalar_lea.vmem [#allocation3], %s3806_s26 }
  0x39   : > { %3609 = dma.done.wait (%p3761_p7), %s152_s18, 1536  }
  0x3a   : > { %3611 = vsyncadd (%p3761_p7), %s152_s18, 4294965760  ;;  %s173_s23 = sand.u32 1, %s3622_s10   ;;  %p2587_p4 = scmp.ne.s32.totalorder %s3642_s15, 0 }
  0x3b   : > { %s2586_s20 = sshll.u32 %s173_s23, 5  ;;  %s3879_s21 = smov (!%p2587_p4), 0  }
  0x3c   : > { %s3816_s24 = scalar_lea.vmem [#allocation6], %s2586_s20  ;;  %179 = sbr.rel (%p2587_p4) target bundleno = 286 (0x11e), region = 36 }
  0x41   : > { %v3822_v0 = vld [vmem:[%s4840_s1] sm:$0xff]  ;;  %v3827_v1 = vld [vmem:[%s4840_s1 + $0x8] sm:$0xff]  ;;  %v3832_v2 = vld [vmem:[%s4840_s1 + $0x10] sm:$0xff] }
  0x42   : > { %v3837_v3 = vld [vmem:[%s4840_s1 + $0x18] sm:$0xff]  ;;  %v3842_v4 = vld [vmem:[%s4840_s1 + $0x20] sm:$0xff]  ;;  %v3847_v5 = vld [vmem:[%s4840_s1 + $0x28] sm:$0xff] }
  0x43   : > { %v3852_v6 = vld [vmem:[%s4840_s1 + $0x30] sm:$0xff]  ;;  %v3857_v7 = vld [vmem:[%s4840_s1 + $0x38] sm:$0xff]  ;;  %v3862_v8 = vld [vmem:[%s4840_s1 + $0x40] sm:$0xff] }
  0x44   : > { %v3867_v9 = vld [vmem:[%s4840_s1 + $0x48] sm:$0xff]  ;;  %v3872_v10 = vld [vmem:[%s4840_s1 + $0x50] sm:$0xff]  ;;  %v3877_v11 = vld [vmem:[%s4840_s1 + $0x58] sm:$0xff] }
  0x45 LB: >> { %vm207_vm0 = vcmask 261120   ;;  %s2588_s30 = sshll.u32 %s3662_s21, 7  ;;  %s197_s21 = sadd.s32 1, %s3662_s21   ;;  %s3662_s21 = sphi %s3879_s21, %s197_s21  }
  0x46   : >> { %2941 = vmatprep.mubr.msk.f32.mxu0 %vm207_vm0, %v3822_v0  ;;  %2950 = vmatprep.mubr.msk.f32.mxu1 %vm207_vm0, %v3852_v6  ;;  %s3889_s28 = sshra.s32 %s2588_s30, 7  ;;  %p194_p7 = scmp.ge.s32.totalorder %s197_s21, 3  }
  0x47   : >> { %s2589_s25 = sshll.u32 %s3889_s28, 3 }
  0x48   : >> { %s202_s8 = scalar_lea.vmem %s155_s22, %s2589_s25 [#allocation3]  ;;  %s370_s7 = scalar_lea.vmem [#allocation2], %s2589_s25 }
  0x49   : >> { %v206_v12 = vld [vmem:[%s202_s8 + $0x48] sm:$0xff]  ;;  %v205_v13 = vld [vmem:[%s202_s8 + $0x30] sm:$0xff]  ;;  %v204_v14 = vld [vmem:[%s202_s8 + $0x18] sm:$0xff] }
  0x4a   : >> { %2933 = vmatprep.subr.mxu0 %v206_v12  ;;  %3181 = vmatprep.subr.mxu1 %v206_v12  ;;  %v203_v15 = vld [vmem:[%s202_s8] sm:$0xff] }
  0x4b   : >> { %2934 = vmatpush3.msra.mxu0 %v206_v12  ;;  %3185 = vmatpush3.msra.mxu1 %v206_v12 }
  0x4c   : >> { %2935 = vmatprep.subr.mxu0 %v205_v13  ;;  %3182 = vmatprep.subr.mxu1 %v205_v13 }
  0x4d   : >> { %2936 = vmatpush3.msra.mxu0 %v205_v13  ;;  %3186 = vmatpush3.msra.mxu1 %v205_v13 }
  0x4e   : >> { %2937 = vmatprep.subr.mxu0 %v204_v14  ;;  %3183 = vmatprep.subr.mxu1 %v204_v14 }
  0x4f   : >> { %2938 = vmatpush3.msra.mxu0 %v204_v14  ;;  %3187 = vmatpush3.msra.mxu1 %v204_v14 }
  0x50   : >> { %2939 = vmatprep.subr.mxu0 %v203_v15  ;;  %3184 = vmatprep.subr.mxu1 %v203_v15 }
  0x51   : >> { %2940 = vmatpush3.msra.mxu0 %v203_v15  ;;  %3188 = vmatpush3.msra.mxu1 %v203_v15 }
  0x52   : >> { %2942 = vmatmul.mubr.msk.f32.vlgmr.msra.gmra.mxu0 %vm207_vm0, %v3827_v1  ;;  %2951 = vmatmul.mubr.msk.f32.vlgmr.msra.gmra.mxu1 %vm207_vm0, %v3857_v7 }
  0x53   : >> { %2944 = vmatprep.mubr.msk.f32.mxu0 %vm207_vm0, %v3832_v2  ;;  %2953 = vmatprep.mubr.msk.f32.mxu1 %vm207_vm0, %v3862_v8 }
  0x56   : >> { %2945 = vmatmul.mubr.msk.f32.gmra.mxu0 %vm207_vm0, %v3837_v3  ;;  %2954 = vmatmul.mubr.msk.f32.gmra.mxu1 %vm207_vm0, %v3867_v9 }
  0x57   : >> { %2947 = vmatprep.mubr.msk.f32.mxu0 %vm207_vm0, %v3842_v4  ;;  %2956 = vmatprep.mubr.msk.f32.mxu1 %vm207_vm0, %v3872_v10 }
  0x5a   : >> { %2948 = vmatmul.mubr.msk.f32.gmra.mxu0 %vm207_vm0, %v3847_v5  ;;  %2957 = vmatmul.mubr.msk.f32.gmra.mxu1 %vm207_vm0, %v3877_v11 }
 0x112   : >> { %v2943_v16 = vpop.f32.mrf.mxu0  ;;  %v2952_v17 = vpop.f32.mrf.mxu1 }
 0x113   : >> { %372 = vst [vmem:[%s370_s7 + $0x18] sm:$0xff] %v2943_v16  ;;  %378 = vst [vmem:[%s370_s7 + $0xa8] sm:$0xff] %v2952_v17 }
 0x114   : >> { %v310_v18 = vpop.f32.mrf.mxu0  ;;  %v340_v19 = vpop.f32.mrf.mxu1 }
 0x115   : >> { %371 = vst [vmem:[%s370_s7] sm:$0xff] %v310_v18  ;;  %377 = vst [vmem:[%s370_s7 + $0x90] sm:$0xff] %v340_v19 }
 0x116   : >> { %v2946_v20 = vpop.f32.mrf.mxu0  ;;  %v2955_v21 = vpop.f32.mrf.mxu1 }
 0x117   : >> { %374 = vst [vmem:[%s370_s7 + $0x48] sm:$0xff] %v2946_v20  ;;  %380 = vst [vmem:[%s370_s7 + $0xd8] sm:$0xff] %v2955_v21 }
 0x118   : >> { %v320_v22 = vpop.f32.mrf.mxu0  ;;  %v350_v23 = vpop.f32.mrf.mxu1 }
 0x119   : >> { %373 = vst [vmem:[%s370_s7 + $0x30] sm:$0xff] %v320_v22  ;;  %379 = vst [vmem:[%s370_s7 + $0xc0] sm:$0xff] %v350_v23  ;;  %196 = sbr.rel (!%p194_p7) target bundleno = 69 (0x45), region = 87 }
 0x11a   : >> { %v2949_v24 = vpop.f32.mrf.mxu0  ;;  %v2958_v25 = vpop.f32.mrf.mxu1 }
 0x11b   : >> { %376 = vst [vmem:[%s370_s7 + $0x78] sm:$0xff] %v2949_v24  ;;  %382 = vst [vmem:[%s370_s7 + $0x108] sm:$0xff] %v2958_v25 }
 0x11c   : >> { %v330_v26 = vpop.f32.mrf.mxu0  ;;  %v360_v27 = vpop.f32.mrf.mxu1 }
 0x11d   : >> { %375 = vst [vmem:[%s370_s7 + $0x60] sm:$0xff] %v330_v26  ;;  %381 = vst [vmem:[%s370_s7 + $0xf0] sm:$0xff] %v360_v27 }
 0x11e PF: > { %s2603_s12 = sshll.u32 %s3642_s15, 7  ;;  %vm643_vm1 = vcmask 130048   ;;  %s3192_s26 = smul.u32 12, %s3646_s16 }
 0x11f   : > { %s529_s18 = sshra.s32 %s2603_s12, 7  ;;  %s2483_s29 = sshll.u32 %s3816_s24, 4  ;;  %s4768_s29 = int_to_ptr.vmem [resolvable:$true] %s2483_s29 }
 0x120   : > { %s2604_s20 = sshll.u32 %s529_s18, 3  ;;  %s2480_s22 = sadd.s32 %s3642_s15, %s3192_s26 }
 0x121   : > { %s3922_s27 = scalar_lea.vmem [#allocation2], %s2604_s20  ;;  %s2702_s21 = sshll.u32 %s2480_s22, 7 }
 0x122   : > { %s4774_s15 = scalar_lea.hbm %s4841_s2, %s2702_s21  ;;  %s4779_s28 = scalar_lea.sflag [#allocation5], %s173_s23 }
 0x123   : > { %s3534_s25 = scalar_lea.vmem %s4768_s29, 512  ;;  %s3668_s8 = smov [#allocation6]  }
 0x124   : > { %v535_v28 = vld [vmem:[#allocation2 + $0x30] sm:$0xff]  ;;  %v536_v29 = vld [vmem:[#allocation2 + $0x38] sm:$0xff]  ;;  %v538_v30 = vld [vmem:[#allocation2 + $0x48] sm:$0xff]  ;;  %p3535_p5 = scmp.ne.s32.totalorder %s4768_s29, %s3534_s25  ;;  %s3538_s7 = sshll.u32 %s3668_s8, 4  ;;  %s3539_s7 = int_to_ptr.vmem [resolvable:$false] %s3538_s7 }
 0x125   : > { %547 = vxpose.xlu0.b32.start [1/2] (short) %v535_v28, 128  ;;  %579 = vxpose.xlu1.b32.start [1/2] (short) %v536_v29, 128  ;;  %v539_v31 = vld [vmem:[#allocation2 + $0x50] sm:$0xff]  ;;  %v534_v32 = vld [vmem:[%s3922_s27 + $0x18] sm:$0xff]  ;;  %v533_v33 = vld [vmem:[%s3922_s27] sm:$0xff]  ;;  %s3540_s12 = scalar_lea.vmem %s3539_s7, 1024  ;;  %p3541_p10 = scmp.lt.s32.totalorder %s4768_s29, %s3539_s7 }
 0x126   : > { %2959 = vmatprep.subr.mxu0 %v534_v32  ;;  %v537_v34 = vld [vmem:[#allocation2 + $0x40] sm:$0xff]  ;;  %v540_v35 = vld [vmem:[#allocation2 + $0x58] sm:$0xff]  ;;  %v1504_v22 = vld [vmem:[#allocation2 + $0xc8] sm:$0xff]  ;;  %p3536_p8 = pnand %p3535_p5, %p3769_p12  ;;  %p3542_p3 = scmp.lt.s32.totalorder %s3540_s12, %s3534_s25 }
 0x127   : > { %2960 = vmatpush3.msra.mxu0 %v534_v32  ;;  %v1503_v20 = vld [vmem:[#allocation2 + $0xc0] sm:$0xff]  ;;  %v1506_v21 = vld [vmem:[#allocation2 + $0xd8] sm:$0xff]  ;;  %v1505_v26 = vld [vmem:[#allocation2 + $0xd0] sm:$0xff] }
 0x128   : > { %2961 = vmatprep.subr.mxu0 %v533_v33  ;;  %v1507_v23 = vld [vmem:[#allocation2 + $0xe0] sm:$0xff]  ;;  %p3537_p9 = pneg %p3536_p8  ;;  %p3543_p11 = por %p3542_p3, %p3541_p10 }
 0x129   : > { %548 = vxpose.xlu0.b32.end [2/2] (short) %v538_v30, 128  ;;  %580 = vxpose.xlu1.b32.end [2/2] (short) %v539_v31, 128 }
 0x12a   : > { %2962 = vmatpush3.msra.mxu0 %v533_v33  ;;  %v1508_v33 = vld [vmem:[#allocation2 + $0xe8] sm:$0xff]  ;;  %p3544_p13 = pnand %p3543_p11, %p3537_p9 }
 0x162   : > { %611 = vxpose.xlu0.b32.start [1/2] (short) %v537_v34, 128  ;;  %1515 = vxpose.xlu1.b32.start [1/2] (short) %v1503_v20, 128 }
 0x166   : > { %612 = vxpose.xlu0.b32.end [2/2] (short) %v540_v35, 128  ;;  %1516 = vxpose.xlu1.b32.end [2/2] (short) %v1506_v21, 128 }
 0x19f   : > { %1547 = vxpose.xlu0.b32.start [1/2] (short) %v1504_v22, 128  ;;  %1579 = vxpose.xlu1.b32.start [1/2] (short) %v1505_v26, 128 }
 0x1a1   : > { %v563_v36 = vpop.trf.xlu0  ;;  %v595_v37 = vpop.trf.xlu1 }
 0x1a2   : > { %2963 = vmatprep.mubr.msk.f32.mxu0 %vm643_vm1, %v563_v36 }
 0x1a3   : > { %1548 = vxpose.xlu0.b32.end [2/2] (short) %v1507_v23, 128  ;;  %1580 = vxpose.xlu1.b32.end [2/2] (short) %v1508_v33, 128 }
 0x1a5   : > { %v564_v38 = vpop.trf.xlu0  ;;  %v596_v39 = vpop.trf.xlu1 }
 0x1a6   : > { %2964 = vmatmul.mubr.msk.f32.vlgmr.msra.gmra.mxu0 %vm643_vm1, %v564_v38 }
 0x1a9   : > { %v565_v40 = vpop.trf.xlu0  ;;  %v597_v42 = vpop.trf.xlu1 }
 0x1aa   : > { %2966 = vmatprep.mubr.msk.f32.mxu0 %vm643_vm1, %v565_v40 }
 0x1ad   : > { %v566_v41 = vpop.trf.xlu0  ;;  %v598_v44 = vpop.trf.xlu1 }
 0x1ae   : > { %2967 = vmatmul.mubr.msk.f32.gmra.mxu0 %vm643_vm1, %v566_v41 }
 0x1b1   : > { %v567_v43 = vpop.trf.xlu0  ;;  %v599_v47 = vpop.trf.xlu1 }
 0x1b2   : > { %2969 = vmatprep.mubr.msk.f32.mxu0 %vm643_vm1, %v567_v43 }
 0x1b5   : > { %v568_v45 = vpop.trf.xlu0  ;;  %v600_v49 = vpop.trf.xlu1 }
 0x1b6   : > { %2970 = vmatmul.mubr.msk.f32.gmra.mxu0 %vm643_vm1, %v568_v45 }
 0x1b9   : > { %v569_v46 = vpop.trf.xlu0  ;;  %v601_v52 = vpop.trf.xlu1 }
 0x1ba   : > { %2972 = vmatprep.mubr.msk.f32.mxu0 %vm643_vm1, %v569_v46 }
 0x1bd   : > { %v570_v48 = vpop.trf.xlu0  ;;  %v602_v54 = vpop.trf.xlu1 }
 0x1be   : > { %2973 = vmatmul.mubr.msk.f32.gmra.mxu0 %vm643_vm1, %v570_v48 }
 0x1c1   : > { %v571_v50 = vpop.trf.xlu0  ;;  %v603_v57 = vpop.trf.xlu1 }
 0x1c2   : > { %2975 = vmatprep.mubr.msk.f32.mxu0 %vm643_vm1, %v571_v50 }
 0x1c5   : > { %v572_v51 = vpop.trf.xlu0  ;;  %v604_v59 = vpop.trf.xlu1 }
 0x1c6   : > { %2976 = vmatmul.mubr.msk.f32.gmra.mxu0 %vm643_vm1, %v572_v51 }
 0x1c9   : > { %v573_v53 = vpop.trf.xlu0  ;;  %v605_v62 = vpop.trf.xlu1 }
 0x1ca   : > { %2978 = vmatprep.mubr.msk.f32.mxu0 %vm643_vm1, %v573_v53 }
 0x1cd   : > { %v574_v55 = vpop.trf.xlu0  ;;  %v606_v0 = vpop.trf.xlu1 }
 0x1ce   : > { %2979 = vmatmul.mubr.msk.f32.gmra.mxu0 %vm643_vm1, %v574_v55 }
 0x1d1   : > { %v575_v56 = vpop.trf.xlu0  ;;  %v607_v3 = vpop.trf.xlu1 }
 0x1d2   : > { %2981 = vmatprep.mubr.msk.f32.mxu0 %vm643_vm1, %v575_v56 }
 0x1d5   : > { %v576_v58 = vpop.trf.xlu0  ;;  %v608_v5 = vpop.trf.xlu1 }
 0x1d6   : > { %2982 = vmatmul.mubr.msk.f32.gmra.mxu0 %vm643_vm1, %v576_v58 }
 0x1d9   : > { %v577_v60 = vpop.trf.xlu0  ;;  %v609_v8 = vpop.trf.xlu1 }
 0x1da   : > { %2984 = vmatprep.mubr.msk.f32.mxu0 %vm643_vm1, %v577_v60 }
 0x1dd   : > { %v578_v61 = vpop.trf.xlu0  ;;  %v610_v10 = vpop.trf.xlu1 }
 0x1de   : > { %2985 = vmatmul.mubr.msk.f32.gmra.mxu0 %vm643_vm1, %v578_v61 }
 0x1df   : > { %2987 = vmatprep.mubr.msk.f32.mxu0 %vm643_vm1, %v595_v37 }
 0x1e1   : > { %v627_v63 = vpop.trf.xlu0 }
 0x1e2   : > { %2988 = vmatmul.mubr.msk.f32.gmra.mxu0 %vm643_vm1, %v596_v39 }
 0x1e3   : > { %2990 = vmatprep.mubr.msk.f32.mxu0 %vm643_vm1, %v597_v42 }
 0x1e5   : > { %v628_v1 = vpop.trf.xlu0 }
 0x1e6   : > { %2991 = vmatmul.mubr.msk.f32.gmra.mxu0 %vm643_vm1, %v598_v44 }
 0x1e7   : > { %2993 = vmatprep.mubr.msk.f32.mxu0 %vm643_vm1, %v599_v47 }
 0x1e9   : > { %v629_v2 = vpop.trf.xlu0 }
 0x1ea   : > { %2994 = vmatmul.mubr.msk.f32.gmra.mxu0 %vm643_vm1, %v600_v49 }
 0x1eb   : > { %2996 = vmatprep.mubr.msk.f32.mxu0 %vm643_vm1, %v601_v52 }
 0x1ed   : > { %v630_v4 = vpop.trf.xlu0 }
 0x1ee   : > { %2997 = vmatmul.mubr.msk.f32.gmra.mxu0 %vm643_vm1, %v602_v54 }
 0x1ef   : > { %2999 = vmatprep.mubr.msk.f32.mxu0 %vm643_vm1, %v603_v57 }
 0x1f1   : > { %v631_v6 = vpop.trf.xlu0 }
 0x1f2   : > { %3000 = vmatmul.mubr.msk.f32.gmra.mxu0 %vm643_vm1, %v604_v59 }
 0x1f3   : > { %3002 = vmatprep.mubr.msk.f32.mxu0 %vm643_vm1, %v605_v62 }
 0x1f5   : > { %v632_v7 = vpop.trf.xlu0 }
 0x1f6   : > { %3003 = vmatmul.mubr.msk.f32.gmra.mxu0 %vm643_vm1, %v606_v0 }
 0x1f7   : > { %3005 = vmatprep.mubr.msk.f32.mxu0 %vm643_vm1, %v607_v3 }
 0x1f9   : > { %v633_v9 = vpop.trf.xlu0 }
 0x1fa   : > { %3006 = vmatmul.mubr.msk.f32.gmra.mxu0 %vm643_vm1, %v608_v5 }
 0x1fb   : > { %3008 = vmatprep.mubr.msk.f32.mxu0 %vm643_vm1, %v609_v8 }
 0x1fd   : > { %v634_v11 = vpop.trf.xlu0 }
 0x1fe   : > { %3009 = vmatmul.mubr.msk.f32.gmra.mxu0 %vm643_vm1, %v610_v10 }
 0x1ff   : > { %3011 = vmatprep.mubr.msk.f32.mxu0 %vm643_vm1, %v627_v63  ;;  %v383_v63 = vlaneseq }
 0x201   : > { %v635_v12 = vpop.trf.xlu0 }
 0x202   : > { %3012 = vmatmul.mubr.msk.f32.gmra.mxu0 %vm643_vm1, %v628_v1 }
 0x203   : > { %3014 = vmatprep.mubr.msk.f32.mxu0 %vm643_vm1, %v629_v2 }
 0x205   : > { %v636_v13 = vpop.trf.xlu0 }
 0x206   : > { %3015 = vmatmul.mubr.msk.f32.gmra.mxu0 %vm643_vm1, %v630_v4 }
 0x207   : > { %3017 = vmatprep.mubr.msk.f32.mxu0 %vm643_vm1, %v631_v6 }
 0x209   : > { %v637_v14 = vpop.trf.xlu0 }
 0x20a   : > { %3018 = vmatmul.mubr.msk.f32.gmra.mxu0 %vm643_vm1, %v632_v7  ;;  %v384_v7 = vshrl.u32 %v383_v63, 7 }
 0x20b   : > { %3020 = vmatprep.mubr.msk.f32.mxu0 %vm643_vm1, %v633_v9 }
 0x20d   : > { %v638_v15 = vpop.trf.xlu0 }
 0x20e   : > { %3021 = vmatmul.mubr.msk.f32.gmra.mxu0 %vm643_vm1, %v634_v11 }
 0x20f   : > { %3023 = vmatprep.mubr.msk.f32.mxu0 %vm643_vm1, %v635_v12 }
 0x211   : > { %v639_v16 = vpop.trf.xlu0 }
 0x212   : > { %3024 = vmatmul.mubr.msk.f32.gmra.mxu0 %vm643_vm1, %v636_v13 }
 0x213   : > { %3026 = vmatprep.mubr.msk.f32.mxu0 %vm643_vm1, %v637_v14 }
 0x215   : > { %v640_v17 = vpop.trf.xlu0 }
 0x216   : > { %3027 = vmatmul.mubr.msk.f32.gmra.mxu0 %vm643_vm1, %v638_v15 }
 0x217   : > { %3029 = vmatprep.mubr.msk.f32.mxu0 %vm643_vm1, %v639_v16 }
 0x219   : > { %v641_v18 = vpop.trf.xlu0 }
 0x21a   : > { %3030 = vmatmul.mubr.msk.f32.gmra.mxu0 %vm643_vm1, %v640_v17 }
 0x21b   : > { %3032 = vmatprep.mubr.msk.f32.mxu0 %vm643_vm1, %v641_v18  ;;  %v426_v18 = vadd.s32 336, %v384_v7 }
 0x21d   : > { %v642_v19 = vpop.trf.xlu0  ;;  %vm474_vm2 = vcmp.lt.s32.totalorder %v426_v18, 343 }
 0x21e   : > { %3033 = vmatmul.mubr.msk.f32.gmra.mxu0 %vm643_vm1, %v642_v19 }
 0x266   : > { %v3974_v24 = vpop.f32.mrf.mxu0 }
 0x268   : > { %v3976_v25 = vpop.f32.mrf.mxu0 }
 0x26e   : > { %v3978_v27 = vpop.f32.mrf.mxu0 }
 0x270   : > { %v3980_v28 = vpop.f32.mrf.mxu0 }
 0x276   : > { %v3982_v29 = vpop.f32.mrf.mxu0 }
 0x277   : > { %v1094_v2 = vmax.f32 %v3974_v24, %v3982_v29 }
 0x278   : > { %v3984_v30 = vpop.f32.mrf.mxu0 }
 0x279   : > { %v1093_v1 = vmax.f32 %v3976_v25, %v3984_v30 }
 0x27e   : > { %v3986_v31 = vpop.f32.mrf.mxu0 }
 0x27f   : > { %v1096_v3 = vmax.f32 %v3978_v27, %v3986_v31 }
 0x280   : > { %v3988_v32 = vpop.f32.mrf.mxu0 }
 0x281   : > { %v1095_v4 = vmax.f32 %v3980_v28, %v3988_v32 }
 0x286   : > { %v3990_v34 = vpop.f32.mrf.mxu0 }
 0x287   : > { %v1098_v8 = vmax.f32 %v1094_v2, %v3990_v34 }
 0x288   : > { %v3992_v35 = vpop.f32.mrf.mxu0 }
 0x289   : > { %v1097_v6 = vmax.f32 %v1093_v1, %v3992_v35 }
 0x28e   : > { %v3994_v36 = vpop.f32.mrf.mxu0 }
 0x28f   : > { %v1100_v9 = vmax.f32 %v1096_v3, %v3994_v36 }
 0x290   : > { %v3996_v37 = vpop.f32.mrf.mxu0 }
 0x291   : > { %v1099_v10 = vmax.f32 %v1095_v4, %v3996_v37 }
 0x296   : > { %v3998_v38 = vpop.f32.mrf.mxu0 }
 0x297   : > { %v1102_v13 = vmax.f32 %v1098_v8, %v3998_v38  ;;  %v542_v8 = vld [vmem:[#allocation2 + $0x68] sm:$0xff] }
 0x298   : > { %v4000_v39 = vpop.f32.mrf.mxu0  ;;  %1411 = vmatprep.mubr.f32.mxu1 %v542_v8 }
 0x299   : > { %v1101_v12 = vmax.f32 %v1097_v6, %v4000_v39 }
 0x29e   : > { %v4002_v40 = vpop.f32.mrf.mxu0 }
 0x29f   : > { %v1104_v14 = vmax.f32 %v1100_v9, %v4002_v40 }
 0x2a0   : > { %v4004_v41 = vpop.f32.mrf.mxu0 }
 0x2a1   : > { %v1103_v15 = vmax.f32 %v1099_v10, %v4004_v41 }
 0x2a2   : > { %v4006_v42 = vpop.f32.mrf.mxu0 }
 0x2a3   : > { %v1106_v19 = vmax.f32 %v1102_v13, %v4006_v42 }
 0x2a4   : > { %v4008_v43 = vpop.f32.mrf.mxu0 }
 0x2a5   : > { %v1105_v17 = vmax.f32 %v1101_v12, %v4008_v43 }
 0x2a6   : > { %v4010_v44 = vpop.f32.mrf.mxu0 }
 0x2a7   : > { %v1108_v20 = vmax.f32 %v1104_v14, %v4010_v44  ;;  %v3667_v14 = vmov -1e+30  }
 0x2a8   : > { %v4012_v45 = vpop.f32.mrf.mxu0 }
 0x2a9   : > { %v1107_v21 = vmax.f32 %v1103_v15, %v4012_v45  ;;  %v4090_v15 = vsel %vm474_vm2, 0.0, %v3667_v14 }
 0x2aa   : > { %v4014_v46 = vpop.f32.mrf.mxu0  ;;  %4863 = vst [vmem:[#allocation15_spill] sm:$0xff] %v4090_v15 }
 0x2ab   : > { %v1110_v26 = vmax.f32 %v1106_v19, %v4014_v46 }
 0x2ac   : > { %v4016_v47 = vpop.f32.mrf.mxu0 }
 0x2ad   : > { %v1109_v23 = vmax.f32 %v1105_v17, %v4016_v47 }
 0x2ae   : > { %v4018_v48 = vpop.f32.mrf.mxu0 }
 0x2af   : > { %v1112_v33 = vmax.f32 %v1108_v20, %v4018_v48 }
 0x2b0   : > { %v4020_v49 = vpop.f32.mrf.mxu0 }
 0x2b1   : > { %v1111_v63 = vmax.f32 %v1107_v21, %v4020_v49 }
 0x2b2   : > { %v4022_v50 = vpop.f32.mrf.mxu0 }
 0x2b3   : > { %v1114_v3 = vmax.f32 %v1110_v26, %v4022_v50 }
 0x2b4   : > { %v4024_v51 = vpop.f32.mrf.mxu0 }
 0x2b5   : > { %v1113_v2 = vmax.f32 %v1109_v23, %v4024_v51 }
 0x2b6   : > { %v4026_v52 = vpop.f32.mrf.mxu0 }
 0x2b7   : > { %v1116_v4 = vmax.f32 %v1112_v33, %v4026_v52 }
 0x2b8   : > { %v4028_v53 = vpop.f32.mrf.mxu0 }
 0x2b9   : > { %v1115_v6 = vmax.f32 %v1111_v63, %v4028_v53 }
 0x2ba   : > { %v4030_v54 = vpop.f32.mrf.mxu0 }
 0x2bb   : > { %v1118_v10 = vmax.f32 %v1114_v3, %v4030_v54 }
 0x2bc   : > { %v4032_v55 = vpop.f32.mrf.mxu0 }
 0x2bd   : > { %v1117_v9 = vmax.f32 %v1113_v2, %v4032_v55 }
 0x2be   : > { %v4034_v56 = vpop.f32.mrf.mxu0 }
 0x2bf   : > { %v1120_v12 = vmax.f32 %v1116_v4, %v4034_v56 }
 0x2c0   : > { %v4036_v57 = vpop.f32.mrf.mxu0 }
 0x2c1   : > { %v1119_v13 = vmax.f32 %v1115_v6, %v4036_v57 }
 0x2c2   : > { %v4038_v58 = vpop.f32.mrf.mxu0 }
 0x2c3   : > { %v1122_v19 = vmax.f32 %v1118_v10, %v4038_v58 }
 0x2c4   : > { %v4040_v59 = vpop.f32.mrf.mxu0 }
 0x2c5   : > { %v1121_v18 = vmax.f32 %v1117_v9, %v4040_v59 }
 0x2c6   : > { %v4042_v60 = vpop.f32.mrf.mxu0 }
 0x2c7   : > { %v1124_v20 = vmax.f32 %v1120_v12, %v4042_v60 }
 0x2c8   : > { %v4044_v61 = vpop.f32.mrf.mxu0 }
 0x2c9   : > { %v1123_v21 = vmax.f32 %v1119_v13, %v4044_v61 }
 0x2ca   : > { %v4046_v62 = vpop.f32.mrf.mxu0 }
 0x2cb   : > { %v1126_v3 = vmax.f32 %v1122_v19, %v4046_v62 }
 0x2cc   : > { %v4048_v0 = vpop.f32.mrf.mxu0 }
 0x2cd   : > { %v1125_v26 = vmax.f32 %v1121_v18, %v4048_v0 }
 0x2ce   : > { %v4058_v5 = vpop.f32.mrf.mxu0 }
 0x2cf   : > { %4860 = vst [vmem:[#allocation12_spill] sm:$0xff] %v4058_v5  ;;  %v1128_v4 = vmax.f32 %v1124_v20, %v4058_v5 }
 0x2d0   : > { %v4064_v11 = vpop.f32.mrf.mxu0 }
 0x2d1   : > { %v1127_v8 = vmax.f32 %v1123_v21, %v4064_v11 }
 0x2d2   : > { %v4070_v16 = vpop.f32.mrf.mxu0 }
 0x2d3   : > { %4861 = vst [vmem:[#allocation13_spill] sm:$0xff] %v4070_v16 }
 0x2d4   : > { %v4076_v22 = vpop.f32.mrf.mxu0 }
 0x2d5   : > { %4862 = vst [vmem:[#allocation14_spill] sm:$0xff] %v4076_v22  ;;  %v1129_v9 = vmax.f32 %v1125_v26, %v4076_v22 }
 0x2d6   : > { %v3028_v1 = vpop.f32.mrf.mxu0 }
 0x2d7   : > { %v4097_v33 = vadd.f32 -1e+30, %v3028_v1  ;;  %v1130_v1 = vmax.f32 %v1126_v3, %v4070_v16 }
 0x2d8   : > { %v1064_v7 = vpop.f32.mrf.mxu0 }
 0x2d9   : > { %v4100_v63 = vadd.f32 %v1064_v7, %v4090_v15  ;;  %v1132_v7 = vmax.f32 %v1128_v4, %v4097_v33 }
 0x2da   : > { %v3031_v17 = vpop.f32.mrf.mxu0 }
 0x2db   : > { %v4108_v10 = vadd.f32 -1e+30, %v3031_v17  ;;  %v1131_v14 = vmax.f32 %v1127_v8, %v4100_v63 }
 0x2dc   : > { %v1074_v23 = vpop.f32.mrf.mxu0 }
 0x2dd   : > { %v4102_v2 = vadd.f32 -1e+30, %v1074_v23  ;;  %v1134_v20 = vmax.f32 %v1130_v1, %v4108_v10 }
 0x2de   : > { %v3034_v6 = vpop.f32.mrf.mxu0 }
 0x2df   : > { %v4110_v12 = vadd.f32 -1e+30, %v3034_v6  ;;  %v1133_v18 = vmax.f32 %v1129_v9, %v4102_v2 }
 0x2e0   : > { %v1084_v13 = vpop.f32.mrf.mxu0 }
 0x2e1   : > { %v4116_v19 = vadd.f32 -1e+30, %v1084_v13  ;;  %v1136_v21 = vmax.f32 %v1132_v7, %v4110_v12  ;;  %v1137_v23 = vmax.f32 %v1133_v18, %v1134_v20 }
 0x2e3   : > { %v1135_v17 = vmax.f32 %v1131_v14, %v4116_v19 }
 0x2e5   : > { %v1138_v26 = vmax.f32 %v1135_v17, %v1136_v21 }
 0x2e7   : > { %v1139_v6 = vmax.f32 %v1137_v23, %v1138_v26 }
 0x2e9   : > { %v1140_v15 = vrot.slane %v1139_v6, 4 }
 0x2eb   : > { %v1141_v3 = vmax.f32 %v1139_v6, %v1140_v15 }
 0x2ed   : > { %v1142_v22 = vrot.slane %v1141_v3, 2 }
 0x2ef   : > { %v1143_v5 = vmax.f32 %v1141_v3, %v1142_v22 }
 0x2f1   : > { %v1144_v4 = vrot.slane %v1143_v5, 1 }
 0x2f3   : > { %v4121_v16 = vmax.f32 %v1143_v5, %v1144_v4  ;;  %v4157_v4 = vpop.trf.xlu1 }
 0x2f5   : > { %v1146_v8 = vsub.f32 %v3976_v25, %v4121_v16  ;;  %v1147_v9 = vsub.f32 %v3974_v24, %v4121_v16  ;;  %v1148_v1 = vsub.f32 %v3980_v28, %v4121_v16  ;;  %v1149_v13 = vsub.f32 %v3978_v27, %v4121_v16 }
 0x2f6   : > { %v1150_v22 = vsub.f32 %v3984_v30, %v4121_v16  ;;  %v1151_v5 = vsub.f32 %v3982_v29, %v4121_v16  ;;  %v1152_v24 = vsub.f32 %v3988_v32, %v4121_v16  ;;  %v1153_v27 = vsub.f32 %v3986_v31, %v4121_v16 }
 0x2f7   : > { %v1194_v7 = vmul.f32 1.442695, %v1146_v8  ;;  %v1196_v14 = vmul.f32 1.442695, %v1147_v9  ;;  %v1198_v15 = vmul.f32 1.442695, %v1148_v1  ;;  %v1154_v30 = vsub.f32 %v3992_v35, %v4121_v16 }
 0x2f8   : > { %v1200_v25 = vmul.f32 1.442695, %v1149_v13  ;;  %v1202_v18 = vmul.f32 1.442695, %v1150_v22  ;;  %v1204_v28 = vmul.f32 1.442695, %v1151_v5  ;;  %v1155_v29 = vsub.f32 %v3990_v34, %v4121_v16 }
 0x2f9   : > { %3310 = vpow2.f32 %v1194_v7  ;;  %v1206_v20 = vmul.f32 1.442695, %v1152_v24  ;;  %v1208_v21 = vmul.f32 1.442695, %v1153_v27  ;;  %v1156_v32 = vsub.f32 %v3996_v37, %v4121_v16  ;;  %v4176_v24 = vpop.trf.xlu1 }
 0x2fa   : > { %3312 = vpow2.f32 %v1196_v14  ;;  %v1210_v17 = vmul.f32 1.442695, %v1154_v30  ;;  %v1157_v31 = vsub.f32 %v3994_v36, %v4121_v16  ;;  %v1212_v26 = vmul.f32 1.442695, %v1155_v29 }
 0x2fb   : > { %3314 = vpow2.f32 %v1198_v15  ;;  %v1158_v6 = vsub.f32 %v4000_v39, %v4121_v16  ;;  %v1214_v34 = vmul.f32 1.442695, %v1156_v32  ;;  %v1159_v8 = vsub.f32 %v3998_v38, %v4121_v16 }
 0x2fc   : > { %3316 = vpow2.f32 %v1200_v25  ;;  %v1216_v36 = vmul.f32 1.442695, %v1157_v31  ;;  %v1160_v39 = vsub.f32 %v4004_v41, %v4121_v16  ;;  %v1161_v22 = vsub.f32 %v4002_v40, %v4121_v16 }
 0x2fd   : > { %3318 = vpow2.f32 %v1202_v18  ;;  %v1218_v13 = vmul.f32 1.442695, %v1158_v6  ;;  %v1220_v15 = vmul.f32 1.442695, %v1159_v8  ;;  %v1162_v25 = vsub.f32 %v4008_v43, %v4121_v16  ;;  %v4199_v6 = vpop.trf.xlu1 }
 0x2fe   : > { %3320 = vpow2.f32 %v1204_v28  ;;  %v1177_v41 = vsub.f32 %v4034_v56, %v4121_v16  ;;  %v1222_v18 = vmul.f32 1.442695, %v1160_v39  ;;  %v1163_v40 = vsub.f32 %v4006_v42, %v4121_v16 }
 0x2ff   : > { %3322 = vpow2.f32 %v1206_v20  ;;  %v1176_v30 = vsub.f32 %v4036_v57, %v4121_v16  ;;  %v1224_v20 = vmul.f32 1.442695, %v1161_v22  ;;  %v1164_v56 = vsub.f32 %v4012_v45, %v4121_v16 }
 0x300   : > { %3324 = vpow2.f32 %v1208_v21  ;;  %v1226_v21 = vmul.f32 1.442695, %v1162_v25  ;;  %v1175_v32 = vsub.f32 %v4030_v54, %v4121_v16  ;;  %v1165_v57 = vsub.f32 %v4010_v44, %v4121_v16 }
 0x301   : > { %3326 = vpow2.f32 %v1210_v17  ;;  %v1256_v17 = vmul.f32 1.442695, %v1177_v41  ;;  %v1254_v45 = vmul.f32 1.442695, %v1176_v30  ;;  %v1166_v8 = vsub.f32 %v4016_v47, %v4121_v16  ;;  %v4222_v41 = vpop.trf.xlu1 }
 0x302   : > { %3328 = vpow2.f32 %v1212_v26  ;;  %v1228_v26 = vmul.f32 1.442695, %v1163_v40  ;;  %v1173_v44 = vsub.f32 %v4026_v52, %v4121_v16  ;;  %v1172_v22 = vsub.f32 %v4028_v53, %v4121_v16 }
 0x303   : > { %3330 = vpow2.f32 %v1214_v34  ;;  %v1174_v34 = vsub.f32 %v4032_v55, %v4121_v16  ;;  %v1167_v55 = vsub.f32 %v4014_v46, %v4121_v16  ;;  %v1168_v52 = vsub.f32 %v4020_v49, %v4121_v16 }
 0x304   : > { %3332 = vpow2.f32 %v1216_v36  ;;  %v1230_v36 = vmul.f32 1.442695, %v1164_v56  ;;  %v1234_v25 = vmul.f32 1.442695, %v1166_v8  ;;  %v1171_v46 = vsub.f32 %v4022_v50, %v4121_v16 }
 0x305   : > { %3334 = vpow2.f32 %v1218_v13  ;;  %v1250_v47 = vmul.f32 1.442695, %v1174_v34  ;;  %v1169_v40 = vsub.f32 %v4018_v48, %v4121_v16  ;;  %v1236_v30 = vmul.f32 1.442695, %v1167_v55 }
 0x306   : > { %v4145_v23 = vpop.eup %3310  ;;  %3336 = vpow2.f32 %v1220_v15  ;;  %v1170_v49 = vsub.f32 %v4024_v51, %v4121_v16  ;;  %v1244_v50 = vmul.f32 1.442695, %v1171_v46 }
 0x307   : > { %v4149_v35 = vpop.eup %3312  ;;  %3338 = vpow2.f32 %v1222_v18  ;;  %v1248_v18 = vmul.f32 1.442695, %v1173_v44 }
 0x308   : > { %v1290_v3 = vadd.f32 %v4149_v35, %v4145_v23  ;;  %v4155_v37 = vpop.eup %3314  ;;  %3340 = vpow2.f32 %v1224_v20  ;;  %v1246_v20 = vmul.f32 1.442695, %v1172_v22  ;;  %v1242_v48 = vmul.f32 1.442695, %v1170_v49 }
 0x309   : > { %v4162_v1 = vpop.eup %3316  ;;  %3342 = vpow2.f32 %v1226_v21  ;;  %v1238_v21 = vmul.f32 1.442695, %v1168_v52  ;;  %v1178_v49 = vsub.f32 %v4040_v59, %v4121_v16 }
 0x30a   : > { %v1291_v9 = vadd.f32 %v4155_v37, %v1290_v3  ;;  %v4167_v14 = vpop.eup %3318  ;;  %3344 = vpow2.f32 %v1256_v17 }
 0x30b   : > { %v4172_v5 = vpop.eup %3320  ;;  %3346 = vpow2.f32 %v1228_v26 }
 0x30c   : > { %v1292_v7 = vadd.f32 %v4162_v1, %v1291_v9  ;;  %v4181_v28 = vpop.eup %3322  ;;  %v1252_v9 = vmul.f32 1.442695, %v1175_v32  ;;  %3348 = vpow2.f32 %v1254_v45 }
 0x30d   : > { %v4188_v29 = vpop.eup %3324  ;;  %3350 = vpow2.f32 %v1230_v36 }
 0x30e   : > { %v1293_v38 = vadd.f32 %v4167_v14, %v1292_v7  ;;  %v4195_v31 = vpop.eup %3326  ;;  %v1232_v7 = vmul.f32 1.442695, %v1165_v57  ;;  %3352 = vpow2.f32 %v1252_v9  ;;  %v4231_v57 = vpop.trf.xlu1 }
 0x30f   : > { %v4204_v54 = vpop.eup %3328 }
 0x310   : > { %v1294_v27 = vadd.f32 %v4172_v5, %v1293_v38  ;;  %v4211_v13 = vpop.eup %3330  ;;  %3354 = vpow2.f32 %v1232_v7 }
 0x311   : > { %v4218_v38 = vpop.eup %3332  ;;  %3356 = vpow2.f32 %v1250_v47 }
 0x312   : > { %v1295_v43 = vadd.f32 %v4181_v28, %v1294_v27  ;;  %v3335_v27 = vpop.eup %3334  ;;  %3358 = vpow2.f32 %v1234_v25  ;;  %v4243_v9 = vpop.trf.xlu1 }
 0x313   : > { %v3337_v56 = vpop.eup %3336  ;;  %3360 = vpow2.f32 %v1248_v18 }
 0x314   : > { %v1296_v42 = vadd.f32 %v4188_v29, %v1295_v43  ;;  %v3339_v17 = vpop.eup %3338  ;;  %3362 = vpow2.f32 %v1236_v30 }
 0x315   : > { %3364 = vpow2.f32 %v1246_v20  ;;  %v3341_v34 = vpop.eup %3340 }
 0x316   : > { %v1297_v3 = vadd.f32 %v4195_v31, %v1296_v42  ;;  %v1240_v42 = vmul.f32 1.442695, %v1169_v40  ;;  %3366 = vpow2.f32 %v1238_v21  ;;  %v4233_v51 = vpop.eup %3342  ;;  %v4261_v18 = vpop.trf.xlu1 }
 0x317   : > { %3368 = vpow2.f32 %v1244_v50 }
 0x318   : > { %v1298_v39 = vadd.f32 %v4204_v54, %v1297_v3  ;;  %v4235_v3 = vpop.eup %3344  ;;  %3370 = vpow2.f32 %v1240_v42  ;;  %v1258_v42 = vmul.f32 1.442695, %v1178_v49 }
 0x319   : > { %v4237_v8 = vpop.eup %3346  ;;  %3372 = vpow2.f32 %v1242_v48  ;;  %2771 = vmatprep.subr.mxu1 %v4235_v3 }
 0x31a   : > { %v1299_v15 = vadd.f32 %v4211_v13, %v1298_v39  ;;  %v4241_v44 = vpop.eup %3348  ;;  %2772 = vmatpush3.msra.mxu1 %v3341_v34  ;;  %3374 = vpow2.f32 %v1258_v42 }
 0x31b   : > { %v4245_v39 = vpop.eup %3350  ;;  %2773 = vmatprep.subr.mxu1 %v4241_v44 }
 0x31c   : > { %v1300_v53 = vadd.f32 %v4218_v38, %v1299_v15  ;;  %v4249_v7 = vpop.eup %3352  ;;  %2774 = vmatpush3.msra.mxu1 %v3339_v17 }
 0x31d   : > { %v4251_v22 = vpop.eup %3354  ;;  %2775 = vmatprep.subr.mxu1 %v4249_v7 }
 0x31e   : > { %v1301_v43 = vadd.f32 %v3335_v27, %v1300_v53  ;;  %v4255_v15 = vpop.eup %3356  ;;  %2776 = vmatpush3.msra.mxu1 %v3337_v56 }
 0x31f   : > { %v4257_v52 = vpop.eup %3358  ;;  %2777 = vmatprep.subr.mxu1 %v4255_v15 }
 0x320   : > { %v1302_v32 = vadd.f32 %v3337_v56, %v1301_v43  ;;  %v3361_v46 = vpop.eup %3360  ;;  %2778 = vmatpush3.msra.mxu1 %v3335_v27  ;;  %v1193_v43 = vsub.f32 %v4110_v12, %v4121_v16  ;;  %v1192_v27 = vsub.f32 %v4116_v19, %v4121_v16  ;;  %v4277_v12 = vpop.trf.xlu1  ;;  %v1191_v19 = vsub.f32 %v4108_v10, %v4121_v16 }
 0x321   : > { %v3363_v53 = vpop.eup %3362  ;;  %2779 = vmatprep.subr.mxu1 %v3361_v46  ;;  %v1189_v10 = vsub.f32 %v4097_v33, %v4121_v16  ;;  %v1184_v33 = vsub.f32 %v4064_v11, %v4121_v16  ;;  %v4866_v11 = vld [vmem:[#allocation14_spill] sm:$0xff] }
 0x322   : > { %v1303_v26 = vadd.f32 %v3339_v17, %v1302_v32  ;;  %v3365_v30 = vpop.eup %3364  ;;  %2780 = vmatpush3.msra.mxu1 %v4218_v38  ;;  %v1179_v32 = vsub.f32 %v4038_v58, %v4121_v16  ;;  %v1180_v38 = vsub.f32 %v4044_v61, %v4121_v16  ;;  %v1288_v48 = vmul.f32 1.442695, %v1193_v43 }
 0x323   : > { %v3367_v20 = vpop.eup %3366  ;;  %2781 = vmatprep.subr.mxu1 %v3365_v30  ;;  %v1181_v58 = vsub.f32 %v4042_v60, %v4121_v16  ;;  %v1190_v61 = vsub.f32 %v4102_v2, %v4121_v16  ;;  %v1183_v2 = vsub.f32 %v4046_v62, %v4121_v16  ;;  %v4864_v62 = vld [vmem:[#allocation13_spill] sm:$0xff] }
 0x324   : > { %v1304_v45 = vadd.f32 %v3341_v34, %v1303_v26  ;;  %v3369_v21 = vpop.eup %3368  ;;  %2782 = vmatpush3.msra.mxu1 %v4211_v13  ;;  %v1286_v26 = vmul.f32 1.442695, %v1192_v27  ;;  %v1260_v34 = vmul.f32 1.442695, %v1179_v32  ;;  %3376 = vpow2.f32 %v1288_v48 }
 0x325   : > { %v3371_v50 = vpop.eup %3370  ;;  %2783 = vmatprep.subr.mxu1 %v3369_v21  ;;  %v1187_v49 = vsub.f32 %v4864_v62, %v4121_v16 }
 0x326   : > { %v1305_v36 = vadd.f32 %v4233_v51, %v1304_v45  ;;  %v3373_v59 = vpop.eup %3372  ;;  %2784 = vmatpush3.msra.mxu1 %v4204_v54  ;;  %v1182_v54 = vsub.f32 %v4048_v0, %v4121_v16  ;;  %3378 = vpow2.f32 %v1286_v26  ;;  %v1188_v0 = vsub.f32 %v4100_v63, %v4121_v16  ;;  %v4865_v63 = vld [vmem:[#allocation12_spill] sm:$0xff] }
 0x327   : > { %2785 = vmatprep.subr.mxu1 %v3373_v59  ;;  %3380 = vpow2.f32 %v1260_v34  ;;  %v1185_v43 = vsub.f32 %v4865_v63, %v4121_v16 }
 0x328   : > { %v1306_v55 = vadd.f32 %v4237_v8, %v1305_v36  ;;  %2786 = vmatpush3.msra.mxu1 %v4195_v31  ;;  %v1262_v36 = vmul.f32 1.442695, %v1180_v38  ;;  %v1264_v31 = vmul.f32 1.442695, %v1181_v58 }
 0x329   : > { %2787 = vmatprep.subr.mxu1 %v3371_v50 }
 0x32a   : > { %v1307_v47 = vadd.f32 %v4245_v39, %v1306_v55  ;;  %2788 = vmatpush3.msra.mxu1 %v4188_v29  ;;  %v1284_v55 = vmul.f32 1.442695, %v1191_v19  ;;  %v1282_v29 = vmul.f32 1.442695, %v1190_v61  ;;  %3382 = vpow2.f32 %v1262_v36 }
 0x32b   : > { %2789 = vmatprep.subr.mxu1 %v3367_v20 }
 0x32c   : > { %v1308_v25 = vadd.f32 %v4251_v22, %v1307_v47  ;;  %2790 = vmatpush3.msra.mxu1 %v4181_v28  ;;  %v4294_v47 = vpop.trf.xlu1  ;;  %v1280_v28 = vmul.f32 1.442695, %v1189_v10  ;;  %3384 = vpow2.f32 %v1284_v55 }
 0x32d   : > { %2791 = vmatprep.subr.mxu1 %v3363_v53  ;;  %3386 = vpow2.f32 %v1264_v31 }
 0x32e   : > { %v1309_v40 = vadd.f32 %v4257_v52, %v1308_v25  ;;  %2792 = vmatpush3.msra.mxu1 %v4172_v5  ;;  %3388 = vpow2.f32 %v1282_v29 }
 0x32f   : > { %2793 = vmatprep.subr.mxu1 %v4257_v52 }
 0x330   : > { %v1310_v56 = vadd.f32 %v3363_v53, %v1309_v40  ;;  %v1266_v40 = vmul.f32 1.442695, %v1182_v54  ;;  %2794 = vmatpush3.msra.mxu1 %v4167_v14  ;;  %v1186_v53 = vsub.f32 %v4866_v11, %v4121_v16  ;;  %v4312_v52 = vpop.trf.xlu1  ;;  %v1272_v14 = vmul.f32 1.442695, %v1185_v43 }
 0x331   : > { %2795 = vmatprep.subr.mxu1 %v4251_v22 }
 0x332   : > { %v1311_v17 = vadd.f32 %v3367_v20, %v1310_v56  ;;  %v1278_v56 = vmul.f32 1.442695, %v1188_v0  ;;  %3390 = vpow2.f32 %v1266_v40  ;;  %2796 = vmatpush3.msra.mxu1 %v4162_v1  ;;  %v1274_v16 = vmul.f32 1.442695, %v1186_v53  ;;  %v541_v1 = vld [vmem:[#allocation2 + $0x60] sm:$0xff] }
 0x333   : > { %3392 = vpow2.f32 %v1280_v28  ;;  %2797 = vmatprep.subr.mxu1 %v4245_v39  ;;  %v545_v39 = vld [vmem:[#allocation2 + $0x80] sm:$0xff] }
 0x334   : > { %v1312_v13 = vadd.f32 %v3371_v50, %v1311_v17  ;;  %2798 = vmatpush3.msra.mxu1 %v4155_v37  ;;  %v4327_v37 = vpop.trf.xlu1 }
 0x335   : > { %2799 = vmatprep.subr.mxu1 %v4237_v8 }
 0x336   : > { %v1313_v45 = vadd.f32 %v3373_v59, %v1312_v13  ;;  %2800 = vmatpush3.msra.mxu1 %v4149_v35  ;;  %v4339_v59 = vpop.trf.xlu0 }
 0x337   : > { %2801 = vmatprep.subr.mxu1 %v4233_v51  ;;  %v544_v51 = vld [vmem:[#allocation2 + $0x78] sm:$0xff] }
 0x338   : > { %v1314_v60 = vadd.f32 %v3369_v21, %v1313_v45  ;;  %v1270_v21 = vmul.f32 1.442695, %v1184_v33  ;;  %2802 = vmatpush3.msra.mxu1 %v4145_v23  ;;  %v543_v23 = vld [vmem:[#allocation2 + $0x70] sm:$0xff]  ;;  %v4341_v48 = vpop.trf.xlu1 }
 0x339   : > { %1412 = vmatmul.mubr.f32.vlgmr.msra.gmra.mxu1 %v541_v1 }
 0x33a   : > { %v1315_v25 = vadd.f32 %v3365_v30, %v1314_v60  ;;  %v1268_v30 = vmul.f32 1.442695, %v1183_v2  ;;  %1416 = vmatprep.mubr.f32.mxu1 %v545_v39  ;;  %v4343_v54 = vpop.trf.xlu0 }
 0x33c   : > { %v1316_v20 = vadd.f32 %v3361_v46, %v1315_v25  ;;  %v1276_v46 = vmul.f32 1.442695, %v1187_v49  ;;  %3394 = vpow2.f32 %v1268_v30  ;;  %v4345_v60 = vpop.trf.xlu1 }
 0x33d   : > { %3396 = vpow2.f32 %v1278_v56  ;;  %1417 = vmatmul.mubr.f32.gmra.mxu1 %v544_v51  ;;  %v546_v56 = vld [vmem:[#allocation2 + $0x88] sm:$0xff] }
 0x33e   : > { %v1317_v5 = vadd.f32 %v4255_v15, %v1316_v20  ;;  %3398 = vpow2.f32 %v1270_v21  ;;  %v4320_v15 = vpop.eup %3374  ;;  %3067 = vmatprep.mubr.f32.mxu1 %v543_v23  ;;  %v4347_v25 = vpop.trf.xlu0 }
 0x33f   : > { %3400 = vpow2.f32 %v1276_v46  ;;  %v4324_v50 = vpop.eup %3376 }
 0x340   : > { %v1318_v27 = vadd.f32 %v4249_v7, %v1317_v5  ;;  %3402 = vpow2.f32 %v1272_v14  ;;  %v4329_v8 = vpop.eup %3378  ;;  %3035 = vmatprep.subr.mxu1 %v4324_v50  ;;  %v1544_v40 = vpop.trf.xlu1  ;;  %v1502_v5 = vld [vmem:[%s3922_s27 + $0xa8] sm:$0xff] }
 0x341   : > { %3404 = vpow2.f32 %v1274_v16  ;;  %3036 = vmatpush3.msra.mxu1 %v4324_v50 }
 0x342   : > { %v1319_v22 = vadd.f32 %v4241_v44, %v1318_v27  ;;  %v4333_v44 = vpop.eup %3380  ;;  %3037 = vmatprep.subr.mxu1 %v4329_v8  ;;  %v1566_v28 = vpop.trf.xlu0  ;;  %v1501_v27 = vld [vmem:[%s3922_s27 + $0x90] sm:$0xff] }
 0x343   : > { %3038 = vmatpush3.msra.mxu1 %v4329_v8 }
 0x344   : > { %v1320_v7 = vadd.f32 %v4235_v3, %v1319_v22  ;;  %v3383_v3 = vpop.eup %3382  ;;  %v1545_v63 = vpop.trf.xlu1 }
 0x345   : > { %v3385_v17 = vpop.eup %3384 }
 0x346   : > { %v1321_v35 = vadd.f32 %v4320_v15, %v1320_v7  ;;  %v3387_v38 = vpop.eup %3386  ;;  %3039 = vmatprep.subr.mxu1 %v3385_v17  ;;  %v1567_v11 = vpop.trf.xlu0 }
 0x347   : > { %v3389_v19 = vpop.eup %3388  ;;  %3040 = vmatpush3.msra.mxu1 %v3385_v17 }
 0x348   : > { %v1322_v32 = vadd.f32 %v4333_v44, %v1321_v35  ;;  %v3391_v13 = vpop.eup %3390  ;;  %3041 = vmatprep.subr.mxu1 %v3389_v19  ;;  %v1546_v21 = vpop.trf.xlu1 }
 0x349   : > { %v3393_v58 = vpop.eup %3392  ;;  %3042 = vmatpush3.msra.mxu1 %v3389_v19 }
 0x34a   : > { %v1323_v42 = vadd.f32 %v3383_v3, %v1322_v32  ;;  %v3395_v61 = vpop.eup %3394  ;;  %3043 = vmatprep.subr.mxu1 %v3393_v58  ;;  %v1568_v14 = vpop.trf.xlu0 }
 0x34b   : > { %v3397_v45 = vpop.eup %3396  ;;  %3044 = vmatpush3.msra.mxu1 %v3393_v58 }
 0x34c   : > { %v1324_v26 = vadd.f32 %v3387_v38, %v1323_v42  ;;  %v3399_v36 = vpop.eup %3398  ;;  %3045 = vmatprep.subr.mxu1 %v3397_v45  ;;  %v1595_v16 = vpop.trf.xlu1 }
 0x34d   : > { %v3401_v55 = vpop.eup %3400  ;;  %3046 = vmatpush3.msra.mxu1 %v3397_v45 }
 0x34e   : > { %v1325_v34 = vadd.f32 %v3391_v13, %v1324_v26  ;;  %v3403_v2 = vpop.eup %3402  ;;  %3047 = vmatprep.subr.mxu1 %v3401_v55  ;;  %v1569_v22 = vpop.trf.xlu0 }
 0x34f   : > { %v3405_v0 = vpop.eup %3404  ;;  %3048 = vmatpush3.msra.mxu1 %v3401_v55 }
 0x350   : > { %v1326_v10 = vadd.f32 %v3395_v61, %v1325_v34  ;;  %3049 = vmatprep.subr.mxu1 %v3405_v0  ;;  %v1596_v1 = vpop.trf.xlu1 }
 0x351   : > { %3050 = vmatpush3.msra.mxu1 %v3405_v0 }
 0x352   : > { %v1327_v31 = vadd.f32 %v3399_v36, %v1326_v10  ;;  %3051 = vmatprep.subr.mxu1 %v3403_v2 }
 0x353   : > { %3052 = vmatpush3.msra.mxu1 %v3403_v2 }
 0x354   : > { %v1328_v29 = vadd.f32 %v3403_v2, %v1327_v31  ;;  %3053 = vmatprep.subr.mxu1 %v3399_v36 }
 0x355   : > { %3054 = vmatpush3.msra.mxu1 %v3399_v36 }
 0x356   : > { %v1329_v33 = vadd.f32 %v3405_v0, %v1328_v29  ;;  %3055 = vmatprep.subr.mxu1 %v3395_v61 }
 0x357   : > { %3056 = vmatpush3.msra.mxu1 %v3395_v61 }
 0x358   : > { %v1330_v62 = vadd.f32 %v3401_v55, %v1329_v33  ;;  %3057 = vmatprep.subr.mxu1 %v3391_v13 }
 0x359   : > { %3058 = vmatpush3.msra.mxu1 %v3391_v13 }
 0x35a   : > { %v1331_v49 = vadd.f32 %v3397_v45, %v1330_v62  ;;  %3059 = vmatprep.subr.mxu1 %v3387_v38 }
 0x35b   : > { %3060 = vmatpush3.msra.mxu1 %v3387_v38 }
 0x35c   : > { %v1332_v20 = vadd.f32 %v3393_v58, %v1331_v49  ;;  %3061 = vmatprep.subr.mxu1 %v3383_v3 }
 0x35d   : > { %3062 = vmatpush3.msra.mxu1 %v3383_v3 }
 0x35e   : > { %v1333_v43 = vadd.f32 %v3389_v19, %v1332_v20  ;;  %3063 = vmatprep.subr.mxu1 %v4333_v44 }
 0x35f   : > { %3064 = vmatpush3.msra.mxu1 %v4333_v44 }
 0x360   : > { %v1334_v30 = vadd.f32 %v3385_v17, %v1333_v43  ;;  %3065 = vmatprep.subr.mxu1 %v4320_v15 }
 0x361   : > { %3066 = vmatpush3.msra.mxu1 %v4320_v15  ;;  %v1597_v15 = vpop.trf.xlu1 }
 0x362   : > { %v1335_v53 = vadd.f32 %v4329_v8, %v1334_v30  ;;  %3068 = vmatmul.mubr.f32.vlgmr.msra.gmra.mxu1 %v546_v56  ;;  %3070 = vmatprep.subr.mxu1 %v1502_v5 }
 0x363   : > { %3071 = vmatpush3.msra.mxu1 %v1502_v5  ;;  %3074 = vmatprep.mubr.msk.f32.mxu1 %vm643_vm1, %v4157_v4  ;;  %v1570_v4 = vpop.trf.xlu0 }
 0x364   : > { %v4355_v46 = vadd.f32 %v4324_v50, %v1335_v53  ;;  %3072 = vmatprep.subr.mxu1 %v1501_v27 }
 0x365   : > { %3073 = vmatpush3.msra.mxu1 %v1501_v27 }
 0x366   : > { %3075 = vmatmul.mubr.msk.f32.vlgmr.msra.gmra.mxu1 %vm643_vm1, %v4176_v24 }
 0x367   : > { %3077 = vmatprep.mubr.msk.f32.mxu1 %vm643_vm1, %v4199_v6  ;;  %v1571_v24 = vpop.trf.xlu0  ;;  %v1598_v6 = vpop.trf.xlu1 }
 0x36a   : > { %3078 = vmatmul.mubr.msk.f32.gmra.mxu1 %vm643_vm1, %v4222_v41 }
 0x36b   : > { %3080 = vmatprep.mubr.msk.f32.mxu1 %vm643_vm1, %v4231_v57  ;;  %v1572_v41 = vpop.trf.xlu0  ;;  %v1599_v57 = vpop.trf.xlu1 }
 0x36e   : > { %3081 = vmatmul.mubr.msk.f32.gmra.mxu1 %vm643_vm1, %v4243_v9 }
 0x36f   : > { %3083 = vmatprep.mubr.msk.f32.mxu1 %vm643_vm1, %v4261_v18  ;;  %v1573_v9 = vpop.trf.xlu0  ;;  %v1600_v18 = vpop.trf.xlu1 }
 0x372   : > { %3084 = vmatmul.mubr.msk.f32.gmra.mxu1 %vm643_vm1, %v4277_v12 }
 0x373   : > { %3086 = vmatprep.mubr.msk.f32.mxu1 %vm643_vm1, %v4294_v47  ;;  %v1574_v12 = vpop.trf.xlu0  ;;  %v1601_v47 = vpop.trf.xlu1 }
 0x376   : > { %3087 = vmatmul.mubr.msk.f32.gmra.mxu1 %vm643_vm1, %v4312_v52 }
 0x377   : > { %3089 = vmatprep.mubr.msk.f32.mxu1 %vm643_vm1, %v4327_v37  ;;  %v1575_v52 = vpop.trf.xlu0  ;;  %v1602_v7 = vpop.trf.xlu1 }
 0x37a   : > { %3090 = vmatmul.mubr.msk.f32.gmra.mxu1 %vm643_vm1, %v4341_v48 }
 0x37b   : > { %3092 = vmatprep.mubr.msk.f32.mxu1 %vm643_vm1, %v4345_v60  ;;  %v1576_v39 = vpop.trf.xlu0  ;;  %v1603_v50 = vpop.trf.xlu1 }
 0x37e   : > { %3093 = vmatmul.mubr.msk.f32.gmra.mxu1 %vm643_vm1, %v1544_v40 }
 0x37f   : > { %3095 = vmatprep.mubr.msk.f32.mxu1 %vm643_vm1, %v1545_v63  ;;  %v1577_v37 = vpop.trf.xlu0  ;;  %v1604_v8 = vpop.trf.xlu1 }
 0x382   : > { %3096 = vmatmul.mubr.msk.f32.gmra.mxu1 %vm643_vm1, %v1546_v21 }
 0x383   : > { %3098 = vmatprep.mubr.msk.f32.mxu1 %vm643_vm1, %v4339_v59  ;;  %v1578_v35 = vpop.trf.xlu0  ;;  %v1605_v44 = vpop.trf.xlu1  ;;  %v1337_v59 = vrot.slane %v4355_v46, 4 }
 0x385   : > { %v1338_v38 = vadd.f32 %v1337_v59, %v4355_v46 }
 0x386   : > { %3099 = vmatmul.mubr.msk.f32.gmra.mxu1 %vm643_vm1, %v4343_v54 }
 0x387   : > { %3101 = vmatprep.mubr.msk.f32.mxu1 %vm643_vm1, %v4347_v25  ;;  %v1606_v51 = vpop.trf.xlu1  ;;  %v1339_v42 = vrot.slane %v1338_v38, 2 }
 0x389   : > { %v1340_v19 = vadd.f32 %v1339_v42, %v1338_v38 }
 0x38a   : > { %3102 = vmatmul.mubr.msk.f32.gmra.mxu1 %vm643_vm1, %v1566_v28 }
 0x38b   : > { %3104 = vmatprep.mubr.msk.f32.mxu1 %vm643_vm1, %v1567_v11  ;;  %v1607_v3 = vpop.trf.xlu1  ;;  %v1341_v48 = vrot.slane %v1340_v19, 1 }
 0x38d   : > { %v1342_v13 = vadd.f32 %v1341_v48, %v1340_v19 }
 0x38e   : > { %3105 = vmatmul.mubr.msk.f32.gmra.mxu1 %vm643_vm1, %v1568_v14 }
 0x38f   : > { %3107 = vmatprep.mubr.msk.f32.mxu1 %vm643_vm1, %v1569_v22  ;;  %v1608_v32 = vpop.trf.xlu1  ;;  %3406 = vrcp.f32 %v1342_v13 }
 0x392   : > { %3108 = vmatmul.mubr.msk.f32.gmra.mxu1 %vm643_vm1, %v1570_v4 }
 0x393   : > { %3110 = vmatprep.mubr.msk.f32.mxu1 %vm643_vm1, %v1571_v24  ;;  %v1609_v23 = vpop.trf.xlu1 }
 0x396   : > { %3111 = vmatmul.mubr.msk.f32.gmra.mxu1 %vm643_vm1, %v1572_v41 }
 0x397   : > { %3113 = vmatprep.mubr.msk.f32.mxu1 %vm643_vm1, %v1573_v9  ;;  %v1610_v17 = vpop.trf.xlu1 }
 0x39a   : > { %3114 = vmatmul.mubr.msk.f32.gmra.mxu1 %vm643_vm1, %v1574_v12 }
 0x39b   : > { %3116 = vmatprep.mubr.msk.f32.mxu1 %vm643_vm1, %v1575_v52 }
 0x39c   : > { %v3407_v58 = vpop.eup %3406 }
 0x39d   : > { %v1344_v45 = vmul.f32 %v3407_v58, %v1342_v13 }
 0x39e   : > { %3117 = vmatmul.mubr.msk.f32.gmra.mxu1 %vm643_vm1, %v1576_v39 }
 0x39f   : > { %3119 = vmatprep.mubr.msk.f32.mxu1 %vm643_vm1, %v1577_v37  ;;  %v1345_v36 = vsub.f32 2.0, %v1344_v45 }
 0x3a1   : > { %v1346_v2 = vmul.f32 %v3407_v58, %v1345_v36 }
 0x3a2   : > { %3120 = vmatmul.mubr.msk.f32.gmra.mxu1 %vm643_vm1, %v1578_v35 }
 0x3a3   : > { %3122 = vmatprep.mubr.msk.f32.mxu1 %vm643_vm1, %v1595_v16 }
 0x3a6   : > { %3123 = vmatmul.mubr.msk.f32.gmra.mxu1 %vm643_vm1, %v1596_v1 }
 0x3a7   : > { %3125 = vmatprep.mubr.msk.f32.mxu1 %vm643_vm1, %v1597_v15 }
 0x3aa   : > { %3126 = vmatmul.mubr.msk.f32.gmra.mxu1 %vm643_vm1, %v1598_v6 }
 0x3ab   : > { %3128 = vmatprep.mubr.msk.f32.mxu1 %vm643_vm1, %v1599_v57 }
 0x3ae   : > { %3129 = vmatmul.mubr.msk.f32.gmra.mxu1 %vm643_vm1, %v1600_v18 }
 0x3af   : > { %3131 = vmatprep.mubr.msk.f32.mxu1 %vm643_vm1, %v1601_v47 }
 0x3b2   : > { %3132 = vmatmul.mubr.msk.f32.gmra.mxu1 %vm643_vm1, %v1602_v7 }
 0x3b3   : > { %3134 = vmatprep.mubr.msk.f32.mxu1 %vm643_vm1, %v1603_v50 }
 0x3b6   : > { %3135 = vmatmul.mubr.msk.f32.gmra.mxu1 %vm643_vm1, %v1604_v8 }
 0x3b7   : > { %3137 = vmatprep.mubr.msk.f32.mxu1 %vm643_vm1, %v1605_v44 }
 0x3ba   : > { %3138 = vmatmul.mubr.msk.f32.gmra.mxu1 %vm643_vm1, %v1606_v51 }
 0x3bb   : > { %3140 = vmatprep.mubr.msk.f32.mxu1 %vm643_vm1, %v1607_v3 }
 0x3be   : > { %3141 = vmatmul.mubr.msk.f32.gmra.mxu1 %vm643_vm1, %v1608_v32 }
 0x3bf   : > { %3143 = vmatprep.mubr.msk.f32.mxu1 %vm643_vm1, %v1609_v23 }
 0x3c2   : > { %3144 = vmatmul.mubr.msk.f32.gmra.mxu1 %vm643_vm1, %v1610_v17 }
 0x3f9   : > { %v2803_v26 = vpop.f32.mrf.mxu1 }
 0x3fb   : > { %v2804_v61 = vpop.f32.mrf.mxu1 }
 0x3fc   : > { %v2805_v60 = vadd.f32 %v2804_v61, %v2803_v26 }
 0x3fd   : > { %v2806_v34 = vpop.f32.mrf.mxu1 }
 0x3ff   : > { %v2807_v54 = vpop.f32.mrf.mxu1 }
 0x400   : > { %v2808_v10 = vadd.f32 %v2807_v54, %v2806_v34 }
 0x422   : > { %v3069_v55 = vpop.f32.mrf.mxu1 }
 0x423   : > { %v1494_v31 = vadd.f32 %v3069_v55, %v2808_v10 }
 0x424   : > { %v1488_v0 = vpop.f32.mrf.mxu1 }
 0x425   : > { %v1498_v29 = vmul.f32 %v1494_v31, %v1346_v2  ;;  %v1489_v25 = vadd.f32 %v2805_v60, %v1488_v0 }
 0x426   : > { %v4425_v33 = vpop.f32.mrf.mxu1 }
 0x427   : > { %1500 = vst [vmem:[%s3816_s24 + $0x8] sm:$0xff] %v1498_v29  ;;  %v1497_v40 = vmul.f32 %v1489_v25, %v1346_v2 }
 0x428   : > { %v4428_v62 = vpop.f32.mrf.mxu1 }
 0x429   : > { %1499 = vst [vmem:[%s3816_s24] sm:$0xff] %v1497_v40 }
 0x42a   : > { %v4431_v49 = vpop.f32.mrf.mxu1 }
 0x42c   : > { %v4433_v28 = vpop.f32.mrf.mxu1 }
 0x42e   : > { %v4435_v20 = vpop.f32.mrf.mxu1 }
 0x42f   : > { %v2061_v32 = vmax.f32 %v4425_v33, %v4435_v20 }
 0x430   : > { %v4437_v63 = vpop.f32.mrf.mxu1 }
 0x431   : > { %v2060_v3 = vmax.f32 %v4428_v62, %v4437_v63 }
 0x432   : > { %v4439_v43 = vpop.f32.mrf.mxu1 }
 0x433   : > { %v2063_v23 = vmax.f32 %v4431_v49, %v4439_v43 }
 0x434   : > { %v4441_v30 = vpop.f32.mrf.mxu1 }
 0x435   : > { %v2062_v17 = vmax.f32 %v4433_v28, %v4441_v30 }
 0x436   : > { %v4443_v11 = vpop.f32.mrf.mxu1 }
 0x437   : > { %v2065_v42 = vmax.f32 %v2061_v32, %v4443_v11 }
 0x438   : > { %v4445_v53 = vpop.f32.mrf.mxu1 }
 0x439   : > { %v2064_v38 = vmax.f32 %v2060_v3, %v4445_v53 }
 0x43a   : > { %v4447_v56 = vpop.f32.mrf.mxu1 }
 0x43b   : > { %v2067_v19 = vmax.f32 %v2063_v23, %v4447_v56 }
 0x43c   : > { %v4449_v5 = vpop.f32.mrf.mxu1 }
 0x43d   : > { %v2066_v48 = vmax.f32 %v2062_v17, %v4449_v5 }
 0x43e   : > { %v4451_v21 = vpop.f32.mrf.mxu1 }
 0x43f   : > { %v2069_v58 = vmax.f32 %v2065_v42, %v4451_v21 }
 0x440   : > { %v4453_v46 = vpop.f32.mrf.mxu1 }
 0x441   : > { %v2068_v26 = vmax.f32 %v2064_v38, %v4453_v46  ;;  %v1510_v38 = vld [vmem:[#allocation2 + $0xf8] sm:$0xff] }
 0x442   : > { %v4455_v27 = vpop.f32.mrf.mxu1  ;;  %2378 = vmatprep.mubr.f32.mxu0 %v1510_v38 }
 0x443   : > { %v2071_v61 = vmax.f32 %v2067_v19, %v4455_v27 }
 0x444   : > { %v4457_v14 = vpop.f32.mrf.mxu1 }
 0x445   : > { %v2070_v34 = vmax.f32 %v2066_v48, %v4457_v14 }
 0x446   : > { %v4459_v16 = vpop.f32.mrf.mxu1 }
 0x447   : > { %v2073_v36 = vmax.f32 %v2069_v58, %v4459_v16 }
 0x448   : > { %v4461_v22 = vpop.f32.mrf.mxu1 }
 0x449   : > { %v2072_v54 = vmax.f32 %v2068_v26, %v4461_v22 }
 0x44a   : > { %v4463_v1 = vpop.f32.mrf.mxu1 }
 0x44b   : > { %v2075_v10 = vmax.f32 %v2071_v61, %v4463_v1 }
 0x44c   : > { %v4465_v4 = vpop.f32.mrf.mxu1 }
 0x44d   : > { %v2074_v55 = vmax.f32 %v2070_v34, %v4465_v4 }
 0x44e   : > { %v4467_v15 = vpop.f32.mrf.mxu1 }
 0x44f   : > { %v2077_v31 = vmax.f32 %v2073_v36, %v4467_v15 }
 0x450   : > { %v4469_v24 = vpop.f32.mrf.mxu1 }
 0x451   : > { %v2076_v2 = vmax.f32 %v2072_v54, %v4469_v24 }
 0x452   : > { %v4471_v6 = vpop.f32.mrf.mxu1 }
 0x453   : > { %v2079_v0 = vmax.f32 %v2075_v10, %v4471_v6 }
 0x454   : > { %v4473_v41 = vpop.f32.mrf.mxu1 }
 0x455   : > { %v2078_v29 = vmax.f32 %v2074_v55, %v4473_v41 }
 0x456   : > { %v4475_v57 = vpop.f32.mrf.mxu1 }
 0x457   : > { %v2081_v3 = vmax.f32 %v2077_v31, %v4475_v57  ;;  %v4870_v31 = vld [vmem:[#allocation15_spill] sm:$0xff] }
 0x458   : > { %v4477_v9 = vpop.f32.mrf.mxu1 }
 0x459   : > { %v2080_v40 = vmax.f32 %v2076_v2, %v4477_v9 }
 0x45a   : > { %v4479_v18 = vpop.f32.mrf.mxu1 }
 0x45b   : > { %v2083_v32 = vmax.f32 %v2079_v0, %v4479_v18 }
 0x45c   : > { %v4481_v12 = vpop.f32.mrf.mxu1 }
 0x45d   : > { %v2082_v23 = vmax.f32 %v2078_v29, %v4481_v12 }
 0x45e   : > { %v4483_v47 = vpop.f32.mrf.mxu1 }
 0x45f   : > { %v2085_v19 = vmax.f32 %v2081_v3, %v4483_v47 }
 0x460   : > { %v4485_v52 = vpop.f32.mrf.mxu1 }
 0x461   : > { %v2084_v42 = vmax.f32 %v2080_v40, %v4485_v52 }
 0x462   : > { %v4487_v7 = vpop.f32.mrf.mxu1 }
 0x463   : > { %v2087_v48 = vmax.f32 %v2083_v32, %v4487_v7 }
 0x464   : > { %v4489_v39 = vpop.f32.mrf.mxu1 }
 0x465   : > { %v2086_v26 = vmax.f32 %v2082_v23, %v4489_v39 }
 0x466   : > { %v4491_v50 = vpop.f32.mrf.mxu1 }
 0x467   : > { %v2089_v34 = vmax.f32 %v2085_v19, %v4491_v50 }
 0x468   : > { %v4493_v37 = vpop.f32.mrf.mxu1 }
 0x469   : > { %v2088_v61 = vmax.f32 %v2084_v42, %v4493_v37 }
 0x46a   : > { %v4495_v8 = vpop.f32.mrf.mxu1 }
 0x46b   : > { %v2091_v54 = vmax.f32 %v2087_v48, %v4495_v8 }
 0x46c   : > { %v4497_v35 = vpop.f32.mrf.mxu1 }
 0x46d   : > { %v2090_v36 = vmax.f32 %v2086_v26, %v4497_v35 }
 0x46e   : > { %v4499_v44 = vpop.f32.mrf.mxu1 }
 0x46f   : > { %v2093_v40 = vmax.f32 %v2089_v34, %v4499_v44 }
 0x470   : > { %v4501_v51 = vpop.f32.mrf.mxu1 }
 0x471   : > { %v2092_v55 = vmax.f32 %v2088_v61, %v4501_v51 }
 0x472   : > { %v4511_v59 = vpop.f32.mrf.mxu1 }
 0x473   : > { %4867 = vst [vmem:[#allocation13_spill] sm:$0xff] %v4511_v59  ;;  %v2095_v3 = vmax.f32 %v2091_v54, %v4511_v59 }
 0x474   : > { %v4517_v13 = vpop.f32.mrf.mxu1 }
 0x475   : > { %v2094_v23 = vmax.f32 %v2090_v36, %v4517_v13 }
 0x476   : > { %v4523_v45 = vpop.f32.mrf.mxu1 }
 0x477   : > { %4868 = vst [vmem:[#allocation12_spill] sm:$0xff] %v4523_v45 }
 0x478   : > { %v4529_v60 = vpop.f32.mrf.mxu1 }
 0x479   : > { %4869 = vst [vmem:[#allocation14_spill] sm:$0xff] %v4529_v60  ;;  %v2096_v38 = vmax.f32 %v2092_v55, %v4529_v60 }
 0x47a   : > { %v3139_v25 = vpop.f32.mrf.mxu1 }
 0x47b   : > { %v4548_v2 = vadd.f32 -1e+30, %v3139_v25  ;;  %v2097_v25 = vmax.f32 %v2093_v40, %v4523_v45 }
 0x47c   : > { %v2031_v17 = vpop.f32.mrf.mxu1 }
 0x47d   : > { %v4551_v0 = vadd.f32 %v2031_v17, %v4870_v31  ;;  %v2099_v17 = vmax.f32 %v2095_v3, %v4548_v2 }
 0x47e   : > { %v3142_v58 = vpop.f32.mrf.mxu1 }
 0x47f   : > { %v4559_v42 = vadd.f32 -1e+30, %v3142_v58  ;;  %v2098_v26 = vmax.f32 %v2094_v23, %v4551_v0 }
 0x480   : > { %v2041_v10 = vpop.f32.mrf.mxu1 }
 0x481   : > { %v4553_v29 = vadd.f32 -1e+30, %v2041_v10  ;;  %v2101_v54 = vmax.f32 %v2097_v25, %v4559_v42 }
 0x482   : > { %v3145_v32 = vpop.f32.mrf.mxu1 }
 0x483   : > { %v4561_v19 = vadd.f32 -1e+30, %v3145_v32  ;;  %v2100_v61 = vmax.f32 %v2096_v38, %v4553_v29 }
 0x484   : > { %v2051_v48 = vpop.f32.mrf.mxu1 }
 0x485   : > { %v4567_v34 = vadd.f32 -1e+30, %v2051_v48  ;;  %v2103_v36 = vmax.f32 %v2099_v17, %v4561_v19  ;;  %v2104_v10 = vmax.f32 %v2100_v61, %v2101_v54 }
 0x487   : > { %v2102_v58 = vmax.f32 %v2098_v26, %v4567_v34 }
 0x489   : > { %v2105_v55 = vmax.f32 %v2102_v58, %v2103_v36 }
 0x48b   : > { %v2106_v31 = vmax.f32 %v2104_v10, %v2105_v55 }
 0x48d   : > { %v2107_v32 = vrot.slane %v2106_v31, 4 }
 0x48f   : > { %v2108_v40 = vmax.f32 %v2106_v31, %v2107_v32 }
 0x491   : > { %v2109_v60 = vrot.slane %v2108_v40, 2 }
 0x493   : > { %v2110_v59 = vmax.f32 %v2108_v40, %v2109_v60 }
 0x495   : > { %v2111_v3 = vrot.slane %v2110_v59, 1 }
 0x497   : > { %v4572_v45 = vmax.f32 %v2110_v59, %v2111_v3 }
 0x499   : > { %v2113_v23 = vsub.f32 %v4428_v62, %v4572_v45  ;;  %v2114_v38 = vsub.f32 %v4425_v33, %v4572_v45  ;;  %v2115_v25 = vsub.f32 %v4433_v28, %v4572_v45  ;;  %v2116_v48 = vsub.f32 %v4431_v49, %v4572_v45 }
 0x49a   : > { %v2117_v60 = vsub.f32 %v4437_v63, %v4572_v45  ;;  %v2118_v59 = vsub.f32 %v4435_v20, %v4572_v45  ;;  %v2119_v33 = vsub.f32 %v4441_v30, %v4572_v45  ;;  %v2120_v49 = vsub.f32 %v4439_v43, %v4572_v45 }
 0x49b   : > { %v2161_v17 = vmul.f32 1.442695, %v2113_v23  ;;  %v2163_v26 = vmul.f32 1.442695, %v2114_v38  ;;  %v2165_v61 = vmul.f32 1.442695, %v2115_v25  ;;  %v2121_v63 = vsub.f32 %v4445_v53, %v4572_v45 }
 0x49c   : > { %v2167_v62 = vmul.f32 1.442695, %v2116_v48  ;;  %v2169_v28 = vmul.f32 1.442695, %v2117_v60  ;;  %v2171_v54 = vmul.f32 1.442695, %v2118_v59  ;;  %v2122_v20 = vsub.f32 %v4443_v11, %v4572_v45 }
 0x49d   : > { %3408 = vpow2.f32 %v2161_v17  ;;  %v2173_v36 = vmul.f32 1.442695, %v2119_v33  ;;  %v2175_v58 = vmul.f32 1.442695, %v2120_v49  ;;  %v2123_v30 = vsub.f32 %v4449_v5, %v4572_v45 }
 0x49e   : > { %3410 = vpow2.f32 %v2163_v26  ;;  %v2177_v10 = vmul.f32 1.442695, %v2121_v63  ;;  %v2124_v43 = vsub.f32 %v4447_v56, %v4572_v45  ;;  %v2179_v31 = vmul.f32 1.442695, %v2122_v20 }
 0x49f   : > { %3412 = vpow2.f32 %v2165_v61  ;;  %v2125_v32 = vsub.f32 %v4453_v46, %v4572_v45  ;;  %v2181_v11 = vmul.f32 1.442695, %v2123_v30  ;;  %v2126_v3 = vsub.f32 %v4451_v21, %v4572_v45 }
 0x4a0   : > { %3414 = vpow2.f32 %v2167_v62  ;;  %v2183_v23 = vmul.f32 1.442695, %v2124_v43  ;;  %v2127_v25 = vsub.f32 %v4457_v14, %v4572_v45  ;;  %v2128_v26 = vsub.f32 %v4455_v27, %v4572_v45 }
 0x4a1   : > { %3416 = vpow2.f32 %v2169_v28  ;;  %v2185_v46 = vmul.f32 1.442695, %v2125_v32  ;;  %v2187_v21 = vmul.f32 1.442695, %v2126_v3  ;;  %v2129_v59 = vsub.f32 %v4461_v22, %v4572_v45 }
 0x4a2   : > { %3418 = vpow2.f32 %v2171_v54  ;;  %v2144_v14 = vsub.f32 %v4487_v7, %v4572_v45  ;;  %v2189_v62 = vmul.f32 1.442695, %v2127_v25  ;;  %v2130_v27 = vsub.f32 %v4459_v16, %v4572_v45 }
 0x4a3   : > { %3420 = vpow2.f32 %v2173_v36  ;;  %v2143_v49 = vsub.f32 %v4489_v39, %v4572_v45  ;;  %v2191_v54 = vmul.f32 1.442695, %v2128_v26  ;;  %v2131_v7 = vsub.f32 %v4465_v4, %v4572_v45 }
 0x4a4   : > { %3422 = vpow2.f32 %v2175_v58  ;;  %v2193_v36 = vmul.f32 1.442695, %v2129_v59  ;;  %v2142_v20 = vsub.f32 %v4483_v47, %v4572_v45  ;;  %v2223_v58 = vmul.f32 1.442695, %v2144_v14 }
 0x4a5   : > { %3424 = vpow2.f32 %v2177_v10  ;;  %v2132_v39 = vsub.f32 %v4463_v1, %v4572_v45  ;;  %v2195_v10 = vmul.f32 1.442695, %v2130_v27  ;;  %v2141_v43 = vsub.f32 %v4485_v52, %v4572_v45 }
 0x4a6   : > { %3426 = vpow2.f32 %v2179_v31  ;;  %v2221_v31 = vmul.f32 1.442695, %v2143_v49  ;;  %v2133_v47 = vsub.f32 %v4469_v24, %v4572_v45  ;;  %v2219_v3 = vmul.f32 1.442695, %v2142_v20 }
 0x4a7   : > { %3428 = vpow2.f32 %v2181_v11  ;;  %v2197_v11 = vmul.f32 1.442695, %v2131_v7  ;;  %v2134_v52 = vsub.f32 %v4467_v15, %v4572_v45  ;;  %v2139_v25 = vsub.f32 %v4481_v12, %v4572_v45 }
 0x4a8   : > { %3430 = vpow2.f32 %v2183_v23  ;;  %v2217_v24 = vmul.f32 1.442695, %v2141_v43  ;;  %v2201_v26 = vmul.f32 1.442695, %v2133_v47  ;;  %v2136_v12 = vsub.f32 %v4471_v6, %v4572_v45 }
 0x4a9   : > { %3432 = vpow2.f32 %v2185_v46  ;;  %v2203_v14 = vmul.f32 1.442695, %v2134_v52 }
 0x4aa   : > { %v4596_v55 = vpop.eup %3408  ;;  %3434 = vpow2.f32 %v2187_v21  ;;  %v2138_v21 = vsub.f32 %v4475_v57, %v4572_v45  ;;  %v2207_v7 = vmul.f32 1.442695, %v2136_v12  ;;  %v2159_v12 = vsub.f32 %v4567_v34, %v4572_v45 }
 0x4ab   : > { %v4600_v53 = vpop.eup %3410  ;;  %3436 = vpow2.f32 %v2189_v62  ;;  %v2137_v62 = vsub.f32 %v4477_v9, %v4572_v45 }
 0x4ac   : > { %v2257_v40 = vadd.f32 %v4600_v53, %v4596_v55  ;;  %v4606_v5 = vpop.eup %3412  ;;  %3438 = vpow2.f32 %v2191_v54  ;;  %v2211_v54 = vmul.f32 1.442695, %v2138_v21  ;;  %v2160_v21 = vsub.f32 %v4561_v19, %v4572_v45 }
 0x4ad   : > { %v4611_v38 = vpop.eup %3414  ;;  %3440 = vpow2.f32 %v2193_v36  ;;  %v2209_v36 = vmul.f32 1.442695, %v2137_v62  ;;  %v2158_v19 = vsub.f32 %v4559_v42, %v4572_v45 }
 0x4ae   : > { %v2258_v56 = vadd.f32 %v4606_v5, %v2257_v40  ;;  %v4616_v17 = vpop.eup %3416  ;;  %v2140_v40 = vsub.f32 %v4479_v18, %v4572_v45  ;;  %3442 = vpow2.f32 %v2223_v58  ;;  %v2135_v18 = vsub.f32 %v4473_v41, %v4572_v45 }
 0x4af   : > { %v4621_v61 = vpop.eup %3418  ;;  %3444 = vpow2.f32 %v2195_v10 }
 0x4b0   : > { %v2259_v48 = vadd.f32 %v4611_v38, %v2258_v56  ;;  %v4628_v28 = vpop.eup %3420  ;;  %v2199_v56 = vmul.f32 1.442695, %v2132_v39  ;;  %3446 = vpow2.f32 %v2221_v31  ;;  %v2205_v49 = vmul.f32 1.442695, %v2135_v18 }
 0x4b1   : > { %v4635_v22 = vpop.eup %3422  ;;  %3448 = vpow2.f32 %v2197_v11  ;;  %v2145_v18 = vsub.f32 %v4493_v37, %v4572_v45 }
 0x4b2   : > { %v2260_v60 = vadd.f32 %v4616_v17, %v2259_v48  ;;  %v4642_v30 = vpop.eup %3424  ;;  %3450 = vpow2.f32 %v2219_v3 }
 0x4b3   : > { %v4649_v32 = vpop.eup %3426  ;;  %3452 = vpow2.f32 %v2199_v56 }
 0x4b4   : > { %v2261_v33 = vadd.f32 %v4621_v61, %v2260_v60  ;;  %v4656_v23 = vpop.eup %3428  ;;  %v2215_v60 = vmul.f32 1.442695, %v2140_v40  ;;  %3454 = vpow2.f32 %v2217_v24 }
 0x4b5   : > { %v3431_v48 = vpop.eup %3430  ;;  %3456 = vpow2.f32 %v2201_v26 }
 0x4b6   : > { %v2262_v63 = vadd.f32 %v4628_v28, %v2261_v33  ;;  %v3433_v59 = vpop.eup %3432  ;;  %v2213_v33 = vmul.f32 1.442695, %v2139_v25  ;;  %3458 = vpow2.f32 %v2215_v60 }
 0x4b7   : > { %v3435_v27 = vpop.eup %3434  ;;  %3460 = vpow2.f32 %v2203_v14  ;;  %v2146_v14 = vsub.f32 %v4491_v50, %v4572_v45  ;;  %v2157_v50 = vsub.f32 %v4553_v29, %v4572_v45  ;;  %v2150_v29 = vsub.f32 %v4499_v44, %v4572_v45 }
 0x4b8   : > { %v2263_v16 = vadd.f32 %v4635_v22, %v2262_v63  ;;  %v3437_v63 = vpop.eup %3436  ;;  %3462 = vpow2.f32 %v2213_v33  ;;  %v2225_v33 = vmul.f32 1.442695, %v2145_v18 }
 0x4b9   : > { %v3439_v20 = vpop.eup %3438  ;;  %3464 = vpow2.f32 %v2205_v49  ;;  %v2227_v49 = vmul.f32 1.442695, %v2146_v14 }
 0x4ba   : > { %v2264_v4 = vadd.f32 %v4642_v30, %v2263_v16  ;;  %v4671_v58 = vpop.eup %3440  ;;  %3466 = vpow2.f32 %v2211_v54  ;;  %v2156_v54 = vsub.f32 %v4548_v2, %v4572_v45  ;;  %v2151_v2 = vsub.f32 %v4517_v13, %v4572_v45  ;;  %v4873_v13 = vld [vmem:[#allocation14_spill] sm:$0xff] }
 0x4bb   : > { %v4673_v16 = vpop.eup %3442  ;;  %3468 = vpow2.f32 %v2207_v7 }
 0x4bc   : > { %v2265_v1 = vadd.f32 %v4649_v32, %v2264_v4  ;;  %v4675_v39 = vpop.eup %3444  ;;  %3470 = vpow2.f32 %v2209_v36  ;;  %2877 = vmatprep.subr.mxu0 %v4673_v16  ;;  %v4871_v36 = vld [vmem:[#allocation12_spill] sm:$0xff] }
 0x4bd   : > { %v4679_v43 = vpop.eup %3446  ;;  %2878 = vmatpush3.msra.mxu0 %v3439_v20  ;;  %3472 = vpow2.f32 %v2225_v33  ;;  %v2154_v44 = vsub.f32 %v4871_v36, %v4572_v45 }
 0x4be   : > { %v2266_v46 = vadd.f32 %v4656_v23, %v2265_v1  ;;  %v4681_v31 = vpop.eup %3448  ;;  %2879 = vmatprep.subr.mxu0 %v4679_v43 }
 0x4bf   : > { %v4685_v47 = vpop.eup %3450  ;;  %2880 = vmatpush3.msra.mxu0 %v3437_v63 }
 0x4c0   : > { %v2267_v15 = vadd.f32 %v3431_v48, %v2266_v46  ;;  %v4687_v11 = vpop.eup %3452  ;;  %2881 = vmatprep.subr.mxu0 %v4685_v47 }
 0x4c1   : > { %v4691_v3 = vpop.eup %3454  ;;  %2882 = vmatpush3.msra.mxu0 %v3435_v27 }
 0x4c2   : > { %v2268_v41 = vadd.f32 %v3433_v59, %v2267_v15  ;;  %v4693_v1 = vpop.eup %3456  ;;  %2883 = vmatprep.subr.mxu0 %v4691_v3 }
 0x4c3   : > { %v3459_v56 = vpop.eup %3458  ;;  %2884 = vmatpush3.msra.mxu0 %v3433_v59 }
 0x4c4   : > { %v2269_v57 = vadd.f32 %v3435_v27, %v2268_v41  ;;  %v3461_v25 = vpop.eup %3460  ;;  %2885 = vmatprep.subr.mxu0 %v3459_v56  ;;  %v2255_v41 = vmul.f32 1.442695, %v2160_v21  ;;  %v2148_v27 = vsub.f32 %v4495_v8, %v4572_v45 }
 0x4c5   : > { %v3463_v46 = vpop.eup %3462  ;;  %2886 = vmatpush3.msra.mxu0 %v3431_v48  ;;  %v2147_v48 = vsub.f32 %v4497_v35, %v4572_v45 }
 0x4c6   : > { %v2270_v6 = vadd.f32 %v3437_v63, %v2269_v57  ;;  %v3465_v26 = vpop.eup %3464  ;;  %2887 = vmatprep.subr.mxu0 %v3463_v46  ;;  %v2251_v57 = vmul.f32 1.442695, %v2158_v19  ;;  %3474 = vpow2.f32 %v2255_v41  ;;  %v2249_v63 = vmul.f32 1.442695, %v2157_v50 }
 0x4c7   : > { %v3467_v15 = vpop.eup %3466  ;;  %2888 = vmatpush3.msra.mxu0 %v4656_v23  ;;  %v2253_v23 = vmul.f32 1.442695, %v2159_v12  ;;  %v2229_v42 = vmul.f32 1.442695, %v2147_v48 }
 0x4c8   : > { %v2271_v9 = vadd.f32 %v3439_v20, %v2270_v6  ;;  %v3469_v59 = vpop.eup %3468  ;;  %2889 = vmatprep.subr.mxu0 %v3467_v15  ;;  %v2247_v6 = vmul.f32 1.442695, %v2156_v54 }
 0x4c9   : > { %v3471_v37 = vpop.eup %3470  ;;  %2890 = vmatpush3.msra.mxu0 %v4649_v32  ;;  %v2149_v32 = vsub.f32 %v4501_v51, %v4572_v45  ;;  %3476 = vpow2.f32 %v2253_v23  ;;  %v2155_v51 = vsub.f32 %v4551_v0, %v4572_v45  ;;  %v4872_v0 = vld [vmem:[#allocation13_spill] sm:$0xff] }
 0x4ca   : > { %v2272_v10 = vadd.f32 %v4671_v58, %v2271_v9  ;;  %2891 = vmatprep.subr.mxu0 %v3471_v37  ;;  %3478 = vpow2.f32 %v2227_v49  ;;  %v2152_v20 = vsub.f32 %v4872_v0, %v4572_v45  ;;  %v2235_v9 = vmul.f32 1.442695, %v2150_v29 }
 0x4cb   : > { %2892 = vmatpush3.msra.mxu0 %v4642_v30  ;;  %v2231_v30 = vmul.f32 1.442695, %v2148_v27  ;;  %3480 = vpow2.f32 %v2229_v42  ;;  %v2233_v7 = vmul.f32 1.442695, %v2149_v32  ;;  %v1514_v42 = vld [vmem:[#allocation2 + $0x118] sm:$0xff] }
 0x4cc   : > { %v2273_v4 = vadd.f32 %v4675_v39, %v2272_v10  ;;  %2893 = vmatprep.subr.mxu0 %v3469_v59  ;;  %3482 = vpow2.f32 %v2251_v57  ;;  %v2153_v10 = vsub.f32 %v4873_v13, %v4572_v45 }
 0x4cd   : > { %2894 = vmatpush3.msra.mxu0 %v4635_v22  ;;  %3484 = vpow2.f32 %v2231_v30 }
 0x4ce   : > { %v2274_v40 = vadd.f32 %v4681_v31, %v2273_v4  ;;  %2895 = vmatprep.subr.mxu0 %v3465_v26  ;;  %v2245_v4 = vmul.f32 1.442695, %v2155_v51  ;;  %3486 = vpow2.f32 %v2249_v63  ;;  %v2241_v45 = vmul.f32 1.442695, %v2153_v10 }
 0x4cf   : > { %2896 = vmatpush3.msra.mxu0 %v4628_v28  ;;  %3488 = vpow2.f32 %v2233_v7 }
 0x4d0   : > { %v2275_v52 = vadd.f32 %v4687_v11, %v2274_v40  ;;  %2897 = vmatprep.subr.mxu0 %v3461_v25  ;;  %v2237_v40 = vmul.f32 1.442695, %v2151_v2  ;;  %3490 = vpow2.f32 %v2247_v6 }
 0x4d1   : > { %2898 = vmatpush3.msra.mxu0 %v4621_v61  ;;  %3492 = vpow2.f32 %v2235_v9 }
 0x4d2   : > { %v2276_v24 = vadd.f32 %v4693_v1, %v2275_v52  ;;  %2899 = vmatprep.subr.mxu0 %v4693_v1  ;;  %v2243_v1 = vmul.f32 1.442695, %v2154_v44  ;;  %3494 = vpow2.f32 %v2245_v4 }
 0x4d3   : > { %2900 = vmatpush3.msra.mxu0 %v4616_v17  ;;  %v2239_v17 = vmul.f32 1.442695, %v2152_v20  ;;  %3496 = vpow2.f32 %v2237_v40 }
 0x4d4   : > { %v2277_v60 = vadd.f32 %v3461_v25, %v2276_v24  ;;  %2901 = vmatprep.subr.mxu0 %v4687_v11  ;;  %v4747_v11 = vpop.eup %3472  ;;  %3498 = vpow2.f32 %v2243_v1  ;;  %v1511_v25 = vld [vmem:[#allocation2 + $0x100] sm:$0xff] }
 0x4d5   : > { %2902 = vmatpush3.msra.mxu0 %v4611_v38  ;;  %v1509_v38 = vld [vmem:[#allocation2 + $0xf0] sm:$0xff]  ;;  %3500 = vpow2.f32 %v2239_v17 }
 0x4d6   : > { %v2278_v62 = vadd.f32 %v3465_v26, %v2277_v60  ;;  %2903 = vmatprep.subr.mxu0 %v4681_v31  ;;  %v1513_v31 = vld [vmem:[#allocation2 + $0x110] sm:$0xff]  ;;  %3502 = vpow2.f32 %v2241_v45 }
 0x4d7   : > { %2904 = vmatpush3.msra.mxu0 %v4606_v5 }
 0x4d8   : > { %v2279_v34 = vadd.f32 %v3469_v59, %v2278_v62  ;;  %2905 = vmatprep.subr.mxu0 %v4675_v39 }
 0x4d9   : > { %2906 = vmatpush3.msra.mxu0 %v4600_v53 }
 0x4da   : > { %v2280_v35 = vadd.f32 %v3471_v37, %v2279_v34  ;;  %2907 = vmatprep.subr.mxu0 %v4671_v58 }
 0x4db   : > { %2908 = vmatpush3.msra.mxu0 %v4596_v55 }
 0x4dc   : > { %v2281_v8 = vadd.f32 %v3467_v15, %v2280_v35  ;;  %2379 = vmatmul.mubr.f32.vlgmr.msra.gmra.mxu0 %v1509_v38 }
 0x4dd   : > { %2383 = vmatprep.mubr.f32.mxu0 %v1513_v31 }
 0x4de   : > { %v2282_v22 = vadd.f32 %v3463_v46, %v2281_v8 }
 0x4e0   : > { %v2283_v28 = vadd.f32 %v3459_v56, %v2282_v22  ;;  %v4751_v56 = vpop.eup %3474 }
 0x4e1   : > { %v4754_v5 = vpop.eup %3476  ;;  %3146 = vmatprep.subr.mxu0 %v4751_v56 }
 0x4e2   : > { %v2284_v61 = vadd.f32 %v4691_v3, %v2283_v28  ;;  %v3479_v53 = vpop.eup %3478  ;;  %3147 = vmatpush3.msra.mxu0 %v4751_v56 }
 0x4e3   : > { %v3481_v58 = vpop.eup %3480  ;;  %3148 = vmatprep.subr.mxu0 %v4754_v5 }
 0x4e4   : > { %v2285_v52 = vadd.f32 %v4685_v47, %v2284_v61  ;;  %v3483_v24 = vpop.eup %3482  ;;  %3149 = vmatpush3.msra.mxu0 %v4754_v5 }
 0x4e5   : > { %v3485_v55 = vpop.eup %3484  ;;  %3150 = vmatprep.subr.mxu0 %v3483_v24 }
 0x4e6   : > { %v2286_v3 = vadd.f32 %v4679_v43, %v2285_v52  ;;  %v3487_v18 = vpop.eup %3486  ;;  %3151 = vmatpush3.msra.mxu0 %v3483_v24 }
 0x4e7   : > { %v3489_v26 = vpop.eup %3488  ;;  %3152 = vmatprep.subr.mxu0 %v3487_v18 }
 0x4e8   : > { %v2287_v47 = vadd.f32 %v4673_v16, %v2286_v3  ;;  %v1512_v16 = vld [vmem:[#allocation2 + $0x108] sm:$0xff]  ;;  %v3491_v60 = vpop.eup %3490  ;;  %3153 = vmatpush3.msra.mxu0 %v3487_v18 }
 0x4e9   : > { %2384 = vmatmul.mubr.f32.gmra.mxu0 %v1512_v16  ;;  %v3493_v15 = vpop.eup %3492  ;;  %3154 = vmatprep.subr.mxu0 %v3491_v60 }
 0x4ea   : > { %v2288_v39 = vadd.f32 %v4747_v11, %v2287_v47  ;;  %3178 = vmatprep.mubr.f32.mxu0 %v1511_v25  ;;  %v3495_v59 = vpop.eup %3494  ;;  %3155 = vmatpush3.msra.mxu0 %v3491_v60 }
 0x4eb   : > { %v3497_v14 = vpop.eup %3496  ;;  %3156 = vmatprep.subr.mxu0 %v3495_v59 }
 0x4ec   : > { %v2289_v43 = vadd.f32 %v3479_v53, %v2288_v39  ;;  %v3499_v37 = vpop.eup %3498  ;;  %3157 = vmatpush3.msra.mxu0 %v3495_v59 }
 0x4ed   : > { %v3501_v48 = vpop.eup %3500  ;;  %3158 = vmatprep.subr.mxu0 %v3499_v37 }
 0x4ee   : > { %v2290_v46 = vadd.f32 %v3481_v58, %v2289_v43  ;;  %v3503_v19 = vpop.eup %3502  ;;  %3159 = vmatpush3.msra.mxu0 %v3499_v37 }
 0x4ef   : > { %3160 = vmatprep.subr.mxu0 %v3503_v19 }
 0x4f0   : > { %v2291_v21 = vadd.f32 %v3485_v55, %v2290_v46  ;;  %3161 = vmatpush3.msra.mxu0 %v3503_v19 }
 0x4f1   : > { %3162 = vmatprep.subr.mxu0 %v3501_v48 }
 0x4f2   : > { %v2292_v12 = vadd.f32 %v3489_v26, %v2291_v21  ;;  %3163 = vmatpush3.msra.mxu0 %v3501_v48 }
 0x4f3   : > { %3164 = vmatprep.subr.mxu0 %v3497_v14 }
 0x4f4   : > { %v2293_v62 = vadd.f32 %v3493_v15, %v2292_v12  ;;  %3165 = vmatpush3.msra.mxu0 %v3497_v14 }
 0x4f5   : > { %3166 = vmatprep.subr.mxu0 %v3493_v15 }
 0x4f6   : > { %v2294_v33 = vadd.f32 %v3497_v14, %v2293_v62  ;;  %3167 = vmatpush3.msra.mxu0 %v3493_v15 }
 0x4f7   : > { %3168 = vmatprep.subr.mxu0 %v3489_v26 }
 0x4f8   : > { %v2295_v41 = vadd.f32 %v3501_v48, %v2294_v33  ;;  %3169 = vmatpush3.msra.mxu0 %v3489_v26 }
 0x4f9   : > { %3170 = vmatprep.subr.mxu0 %v3485_v55 }
 0x4fa   : > { %v2296_v34 = vadd.f32 %v3503_v19, %v2295_v41  ;;  %3171 = vmatpush3.msra.mxu0 %v3485_v55 }
 0x4fb   : > { %3172 = vmatprep.subr.mxu0 %v3481_v58 }
 0x4fc   : > { %v2297_v23 = vadd.f32 %v3499_v37, %v2296_v34  ;;  %3173 = vmatpush3.msra.mxu0 %v3481_v58 }
 0x4fd   : > { %3174 = vmatprep.subr.mxu0 %v3479_v53 }
 0x4fe   : > { %v2298_v27 = vadd.f32 %v3495_v59, %v2297_v23  ;;  %3175 = vmatpush3.msra.mxu0 %v3479_v53 }
 0x4ff   : > { %3176 = vmatprep.subr.mxu0 %v4747_v11 }
 0x500   : > { %v2299_v50 = vadd.f32 %v3491_v60, %v2298_v27  ;;  %3177 = vmatpush3.msra.mxu0 %v4747_v11 }
 0x501   : > { %3179 = vmatmul.mubr.f32.vlgmr.msra.gmra.mxu0 %v1514_v42 }
 0x502   : > { %v2300_v49 = vadd.f32 %v3487_v18, %v2299_v50 }
 0x504   : > { %v2301_v35 = vadd.f32 %v3483_v24, %v2300_v49 }
 0x506   : > { %v2302_v32 = vadd.f32 %v4754_v5, %v2301_v35 }
 0x508   : > { %v2303_v54 = vadd.f32 %v4751_v56, %v2302_v32 }
 0x50a   : > { %v2304_v57 = vrot.slane %v2303_v54, 4 }
 0x50c   : > { %v2305_v8 = vadd.f32 %v2304_v57, %v2303_v54 }
 0x50e   : > { %v2306_v29 = vrot.slane %v2305_v8, 2 }
 0x510   : > { %v2307_v30 = vadd.f32 %v2306_v29, %v2305_v8 }
 0x512   : > { %v2308_v51 = vrot.slane %v2307_v30, 1 }
 0x514   : > { %v2309_v63 = vadd.f32 %v2308_v51, %v2307_v30 }
 0x516   : > { %3504 = vrcp.f32 %v2309_v63 }
 0x523   : > { %v3505_v2 = vpop.eup %3504 }
 0x524   : > { %v2311_v44 = vmul.f32 %v3505_v2, %v2309_v63 }
 0x526   : > { %v2312_v28 = vsub.f32 2.0, %v2311_v44 }
 0x528   : > { %v2313_v13 = vmul.f32 %v3505_v2, %v2312_v28 }
 0x59c   : > { %v2909_v22 = vpop.f32.mrf.mxu0 }
 0x59e   : > { %v2910_v7 = vpop.f32.mrf.mxu0 }
 0x59f   : > { %v2911_v9 = vadd.f32 %v2910_v7, %v2909_v22 }
 0x5a9   : > { %v2912_v36 = vpop.f32.mrf.mxu0 }
 0x5ab   : > { %v2913_v6 = vpop.f32.mrf.mxu0 }
 0x5ac   : > { %v2914_v0 = vadd.f32 %v2913_v6, %v2912_v36 }
 0x5c1   : > { %v3180_v20 = vpop.f32.mrf.mxu0 }
 0x5c2   : > { %v2461_v10 = vadd.f32 %v3180_v20, %v2914_v0 }
 0x5c3   : > { %v2455_v4 = vpop.f32.mrf.mxu0 }
 0x5c4   : > { %v2465_v61 = vmul.f32 %v2461_v10, %v2313_v13  ;;  %v2456_v40 = vadd.f32 %v2911_v9, %v2455_v4 }
 0x5c6   : > { %2467 = vst [vmem:[%s3816_s24 + $0x18] sm:$0xff] %v2465_v61  ;;  %v2464_v1 = vmul.f32 %v2456_v40, %v2313_v13 }
 0x5c8   : > { %2466 = vst [vmem:[%s3816_s24 + $0x10] sm:$0xff] %v2464_v1 }
 0x5c9   : > { %3547 = shalt.err (!%p3544_p13)
}
 0x5ca   : > { %s3548_s23 = scalar_lea.hbm %s4774_s15, 512  ;;  %s3552_s20 = scalar_lea.hbm %s4841_s2, 3072 }
 0x5cb   : > { %p3549_p0 = scmp.ne.s32.totalorder %s4774_s15, %s3548_s23  ;;  %p3553_p4 = scmp.lt.s32.totalorder %s4774_s15, %s4841_s2 }
 0x5cc   : > { %p3554_p7 = scmp.lt.s32.totalorder %s3552_s20, %s3548_s23 }
 0x5cd   : > { %p3550_p1 = pnand %p3549_p0, %p3769_p12 }
 0x5ce   : > { %p3555_p5 = por %p3554_p7, %p3553_p4 }
 0x5cf   : > { %p3551_p6 = pneg %p3550_p1 }
 0x5d1   : > { %p3556_p8 = pnand %p3555_p5, %p3551_p6 }
 0x5d3   : > { %3559 = shalt.err (!%p3556_p8)
}
 0x5d4   : > { %s3669_s22 = smov 128   ;;  %s3670_s21 = smov 384  }
 0x5d5   : > { %s3671_s16 = smov 8  }
 0x5d6   : > { %3195 = dma.vmem_to_hbm [thread:$0]  (%p3769_p12), %s4768_s29, 512, %s4774_s15, %s4779_s28, %s3669_s22, %s3670_s21, %s3671_s16  }
 0x5d7 PF: > { %p3206_p9 = scmp.ge.s32.totalorder %s3658_s19, 2  ;;  %s2498_s30 = sand.u32 1, %s3618_s9  }
 0x5d8   : > { %s2499_s25 = scalar_lea.sflag [#allocation5], %s2498_s30 }
 0x5d9   : > { %p3202_p10 = pnand %p3206_p9, %p3782_p2 }
 0x5db   : > { %p3203_p3 = pneg %p3202_p10 }
 0x5dd   : > { %3613 = dma.done.wait (%p3203_p3), %s2499_s25, 512  }
 0x5de   : > { %3615 = vsyncadd (%p3203_p3), %s2499_s25, 4294966784  ;;  %s18_s19 = sadd.s32 1, %s3658_s19   ;;  %s4874_s16 = sld [smem:[#allocation9_spill]] }
 0x5df   : > { %p15_p11 = scmp.ge.s32.totalorder %s18_s19, 8   ;;  %s4875_s3 = sld [smem:[#allocation10_spill]] }
 0x5e0   : > { %s4876_s18 = sld [smem:[#allocation11_spill]]  ;;  %s4877_s9 = smov %s3622_s10 }
 0x5e1   : > { %s4878_s10 = smov %s3626_s11  ;;  %s4879_s11 = smov %s3777_s5 }
 0x5e2   : > { %s4880_s12 = smov %s3634_s13  ;;  %s4881_s13 = smov %s3638_s14 }
 0x5e3   : > { %s4882_s14 = smov %s3774_s4  ;;  %s4883_s15 = smov %s3650_s17 }
 0x5e4   :  { %17 = sbr.rel (!%p15_p11) target bundleno = 9 (0x9), region = 98 }
 0x5e5   : > { %s4884_s17 = smov %s4875_s3 }
 0x5e9   :  { %2504 = vsyncpa [#allocation4], 1 }
 0x5ea   :  { %2506 = vsyncpa [#allocation4 + $0x1], 1 }
 0x5eb   :  { %2507 = vsyncpa [#allocation5], 1 }
 0x5ec   :  { %2509 = vsyncpa [#allocation5 + $0x1], 1 }

</bundles_post_ra>
